<compile_context>
chip_gen: v5e
topology: v5e:2x2
jax: 0.10.0
libtpu: 0.0.40
codegen_flags: <defaults>
</compile_context>

<pallas_src>
import functools
import math

import jax
import jax.numpy as jnp
from jax.experimental import pallas as pl
from jax.experimental.pallas import tpu as pltpu

# ---------------- synthetic config (small, shapes consistent w/ module) -----
INPUT_HIDDEN = 48          # base.hidden_size (thinker hidden, proj input)
HIDDEN = 64                # talker hidden_size
NUM_HEADS = 4              # num_attention_heads
NUM_KV_HEADS = 2           # num_key_value_heads
HEAD_DIM = 16              # head_dim
NUM_LAYERS = 2             # num_hidden_layers
INTERMEDIATE = 128         # mlp intermediate size
CODEC_VOCAB = 32           # codec_head output size
MROPE_SECTION = (2, 3, 3)  # sums to HEAD_DIM // 2
ROPE_THETA = 1.0e6
RMS_EPS = 1e-6


# ---------------------------- fused Pallas kernel ----------------------------
def _talker_fused_kernel(*refs, num_layers, num_heads, num_kv_heads,
                         head_dim, eps, past_len):
    has_past = past_len > 0
    if has_past:
        (x_ref, cos_ref, sin_ref, rq_ref, rk_ref,
         proj_w_ref, proj_b_ref,
         ln1_ref, wqkv_ref, bqkv_ref, wo_ref,
         ln2_ref, wgu_ref, wd_ref,
         norm_w_ref, head_w_ref, past_ref,
         logits_ref, present_ref) = refs
    else:
        (x_ref, cos_ref, sin_ref, rq_ref, rk_ref,
         proj_w_ref, proj_b_ref,
         ln1_ref, wqkv_ref, bqkv_ref, wo_ref,
         ln2_ref, wgu_ref, wd_ref,
         norm_w_ref, head_w_ref,
         logits_ref, present_ref) = refs
        past_ref = None

    S = x_ref.shape[0]
    P = past_len
    T = P + S
    q_dim = num_heads * head_dim
    kv_dim = num_kv_heads * head_dim
    group = num_heads // num_kv_heads
    neg_inf = float(jnp.finfo(jnp.float32).min)

    def rms(x, w):
        var = jnp.mean(x * x, axis=-1, keepdims=True)
        return x * jax.lax.rsqrt(var + eps) * w

    def bdot(a, b):
        # bf16 MXU operands, f32 accumulation
        return jnp.dot(a.astype(jnp.bfloat16), b.astype(jnp.bfloat16),
                       preferred_element_type=jnp.float32)

    # thinker_to_talker_proj (bias add in f32)
    h = bdot(x_ref[...], proj_w_ref[...]) + proj_b_ref[...]

    cos_q = cos_ref[...]                    # [S, H*Dh]  (head-tiled)
    sin_q = sin_ref[...]
    cos_k = cos_q[:, :kv_dim]               # [S, Hkv*Dh]
    sin_k = sin_q[:, :kv_dim]
    rot_q = rq_ref[...]                     # bf16 block-diag rotate_half matrix
    rot_k = rk_ref[...]

    # Causal additive mask generated IN-KERNEL (no dense f32 mask from HBM).
    # Matches the reference: causal for prefill, all-visible for decode (S=1).
    if num_layers > 1:
        q_pos = jax.lax.broadcasted_iota(jnp.int32, (S, T), 0) + P
        k_pos = jax.lax.broadcasted_iota(jnp.int32, (S, T), 1)
        neg_mask = jnp.where(k_pos <= q_pos, 0.0, neg_inf).astype(jnp.float32)
    else:
        neg_mask = None

    new_cols = []                           # new K/V per layer (lane pieces)
    for l in range(num_layers):
        last_only = (l == num_layers - 1)

        # ---------------- self-attention block ----------------
        residual = h
        xn = rms(h, ln1_ref[l])
        qkv = bdot(xn, wqkv_ref[l]) + bqkv_ref[l]        # [S, 128] lane-dense
        q = qkv[:, :q_dim]                               # scale already folded
        k = qkv[:, q_dim:q_dim + kv_dim]
        v = qkv[:, q_dim + kv_dim:]

        # mrope: x*cos + rotate_half(x)*sin; rotate_half as bf16 +-1 block-diag
        # matmul (single-pass MXU, no lane shuffles).
        q = q * cos_q + bdot(q, rot_q) * sin_q
        k = k * cos_k + bdot(k, rot_k) * sin_k

        new_cols.append(k)
        new_cols.append(v)

        if has_past:
            base = l * 2 * kv_dim
            k_full = jnp.concatenate(
                [past_ref[:, base:base + kv_dim], k], axis=0)
            v_full = jnp.concatenate(
                [past_ref[:, base + kv_dim:base + 2 * kv_dim], v], axis=0)
        else:
            k_full, v_full = k, v

        if last_only:
            # Only the final token feeds the codec head; K/V for the cache were
            # already produced above, so restrict the rest of this layer to the
            # last query row.  Its causal row admits every key -> no mask.
            q = q[S - 1:S, :]
            residual = residual[S - 1:S, :]
            mask_l = None
        else:
            mask_l = neg_mask

        # all heads inside the kernel (unrolled, GQA h -> h // group)
        outs = []
        for hq in range(num_heads):
            hk = hq // group
            q_h = q[:, hq * head_dim:(hq + 1) * head_dim]          # [rows, Dh]
            k_h = k_full[:, hk * head_dim:(hk + 1) * head_dim]     # [T, Dh]
            v_h = v_full[:, hk * head_dim:(hk + 1) * head_dim]     # [T, Dh]
            s_h = jax.lax.dot_general(
                q_h.astype(jnp.bfloat16), k_h.astype(jnp.bfloat16),
                (((1,), (1,)), ((), ())),
                preferred_element_type=jnp.float32)                # [rows, T]
            if mask_l is not None:
                s_h = s_h + mask_l
            s_h = s_h - jnp.max(s_h, axis=-1, keepdims=True)
            p_h = jnp.exp(s_h)
            p_h = p_h * pl.reciprocal(
                jnp.sum(p_h, axis=-1, keepdims=True), approx=True)
            outs.append(bdot(p_h, v_h))                            # [rows, Dh]
        attn = jnp.concatenate(outs, axis=-1)                      # [rows, H*Dh]
        h = residual + bdot(attn, wo_ref[l])

        # ---------------- SwiGLU MLP block ----------------
        residual = h
        xn = rms(h, ln2_ref[l])
        gu = bdot(xn, wgu_ref[l])                                  # [rows, 2*I]
        inter = wgu_ref.shape[2] // 2
        g = gu[:, :inter]
        u = gu[:, inter:]
        h = residual + bdot((g * jax.nn.sigmoid(g)) * u, wd_ref[l])

    # present KV cache: lane-dense [T, 2*L*KV] stores (full-width, unmasked).
    new_all = jnp.concatenate(new_cols, axis=-1)                   # [S, 2*L*KV]
    if has_past:
        present_ref[pl.ds(0, P), :] = past_ref[...]                # past slab
        present_ref[pl.ds(P, S), :] = new_all                      # new rows
    else:
        present_ref[...] = new_all

    # final RMSNorm on the last token (h is already the last row) + codec_head
    last = rms(h[h.shape[0] - 1:, :], norm_w_ref[...])             # [1, D]
    logits_ref[...] = bdot(last, head_w_ref[...])                  # [1, V]


# ---------------------------- model glue (plain JAX) -------------------------
def omni_rotary_flat(position_ids, theta, mrope_section, num_heads):
    """OmniRotary.forward, flattened to head-tiled [S, H*Dh] cos/sin."""
    pos = position_ids.astype(jnp.float32)[..., None]          # [3, 1, S, 1]
    parts, start = [], 0
    for i, sec in enumerate(mrope_section):
        parts.append(pos[i] * theta[None, start:start + sec])   # [1, S, sec]
        start += sec
    idx_theta = jnp.concatenate(parts, axis=-1)                 # [1, S, Dh/2]
    emb = jnp.concatenate([idx_theta, idx_theta], axis=-1)      # [1, S, Dh]
    cos = jnp.tile(jnp.cos(emb)[0], (1, num_heads))             # [S, H*Dh]
    sin = jnp.tile(jnp.sin(emb)[0], (1, num_heads))
    return cos, sin


def _vmem_limit_bytes(args, out_shapes):
    """Scoped-VMEM limit from actual residency (with headroom), not a flat 32MiB."""
    n = sum(int(a.size) * a.dtype.itemsize for a in args)
    n += sum(int(math.prod(s.shape)) * jnp.dtype(s.dtype).itemsize
             for s in out_shapes)
    return int(min(64 * 1024 * 1024, max(8 * 1024 * 1024, 4 * n)))


def talker_forward(params, inputs_embeds, attention_mask, position_ids,
                   past_key_values):
    """Qwen2_5OmniTalker.forward as a single fused pallas_call."""
    del attention_mask  # causal / decode mask is regenerated inside the kernel
    B, S, _ = inputs_embeds.shape
    assert B == 1  # export / generate path is batch-1
    L = NUM_LAYERS
    P = past_key_values.shape[3]
    T = P + S
    KV = NUM_KV_HEADS * HEAD_DIM
    LANES = 2 * L * KV          # 128 for this config -> lane-dense present

    cos, sin = omni_rotary_flat(position_ids, params["theta"], MROPE_SECTION,
                                NUM_HEADS)
    x = inputs_embeds[0]                            # [S, INPUT_HIDDEN]

    args = [x, cos, sin, params["rot_q"], params["rot_k"],
            params["proj_w"], params["proj_b"],
            params["ln1"], params["wqkv"], params["bqkv"], params["wo"],
            params["ln2"], params["wgu"], params["wd"],
            params["norm_w"], params["head_w"]]
    if P > 0:
        # pack past as [P, 2*L*KV]: (layer-major | K,V | kv-head | head-dim)
        past_packed = jnp.transpose(past_key_values[:, :, 0],
                                    (2, 0, 1, 3, 4)).reshape(P, LANES)
        args.append(past_packed.astype(jnp.float32))

    out_shapes = (jax.ShapeDtypeStruct((1, CODEC_VOCAB), jnp.float32),
                  jax.ShapeDtypeStruct((T, LANES), jnp.float32))

    kernel = functools.partial(
        _talker_fused_kernel, num_layers=L, num_heads=NUM_HEADS,
        num_kv_heads=NUM_KV_HEADS, head_dim=HEAD_DIM, eps=RMS_EPS, past_len=P)

    vmem_spec = pl.BlockSpec(memory_space=pltpu.MemorySpace.VMEM)
    logits, present = pl.pallas_call(
        kernel,
        out_shape=out_shapes,
        in_specs=[vmem_spec] * len(args),
        out_specs=(vmem_spec, vmem_spec),
        compiler_params=pltpu.CompilerParams(
            vmem_limit_bytes=_vmem_limit_bytes(args, out_shapes)),
    )(*args)

    # unpack lane-dense present back to the export contract [L,2,1,T,Hkv,Dh] f32
    presents = jnp.transpose(
        present.reshape(T, L, 2, NUM_KV_HEADS, HEAD_DIM),
        (1, 2, 0, 3, 4))[:, :, None]
    return logits, presents


# ---------------------------- deterministic params ---------------------------
def init_params(key):
    keys = iter(jax.random.split(key, 16))
    q_dim = NUM_HEADS * HEAD_DIM
    scale = 1.0 / (HEAD_DIM ** 0.5)

    def dense_f32(*shape):
        return jax.random.normal(next(keys), shape, jnp.float32) * 0.02

    def fbias(*shape):
        return jax.random.normal(next(keys), shape, jnp.float32) * 0.02

    # rotate_half as a per-head block-diagonal +-1 matrix: x @ R == rotate_half(x)
    half = HEAD_DIM // 2
    blk = jnp.zeros((HEAD_DIM, HEAD_DIM), jnp.float32)
    blk = blk.at[half:, :half].set(-jnp.eye(half, dtype=jnp.float32))
    blk = blk.at[:half, half:].set(jnp.eye(half, dtype=jnp.float32))

    qkv_out = (NUM_HEADS + 2 * NUM_KV_HEADS) * HEAD_DIM   # 128 (lane-dense)
    wqkv = dense_f32(NUM_LAYERS, HIDDEN, qkv_out)
    bqkv = fbias(NUM_LAYERS, 1, qkv_out)
    # fold the 1/sqrt(head_dim) attention scale into the q columns (rope is
    # linear in q, so scaling before rope == scaling the attention scores).
    qscale = jnp.concatenate(
        [jnp.full((q_dim,), scale, jnp.float32),
         jnp.ones((qkv_out - q_dim,), jnp.float32)])
    wqkv = wqkv * qscale
    bqkv = bqkv * qscale

    return {
        "proj_w": dense_f32(INPUT_HIDDEN, HIDDEN).astype(jnp.bfloat16),
        "proj_b": fbias(1, HIDDEN),
        "theta": 1.0 / (ROPE_THETA ** (jnp.arange(0, HEAD_DIM, 2,
                                                  dtype=jnp.float32)
                                       / HEAD_DIM)),
        # bf16 (+-1 / 0 exactly representable) -> single-pass MXU on v5e/v6e
        "rot_q": jnp.kron(jnp.eye(NUM_HEADS, dtype=jnp.float32),
                          blk).astype(jnp.bfloat16),
        "rot_k": jnp.kron(jnp.eye(NUM_KV_HEADS, dtype=jnp.float32),
                          blk).astype(jnp.bfloat16),
        "ln1": jnp.ones((NUM_LAYERS, 1, HIDDEN), jnp.float32),
        "ln2": jnp.ones((NUM_LAYERS, 1, HIDDEN), jnp.float32),
        "wqkv": wqkv.astype(jnp.bfloat16),                  # fused q|k|v
        "bqkv": bqkv,
        "wo": dense_f32(NUM_LAYERS, NUM_HEADS * HEAD_DIM,
                        HIDDEN).astype(jnp.bfloat16),
        "wgu": dense_f32(NUM_LAYERS, HIDDEN,
                         2 * INTERMEDIATE).astype(jnp.bfloat16),  # gate|up
        "wd": dense_f32(NUM_LAYERS, INTERMEDIATE, HIDDEN).astype(jnp.bfloat16),
        "norm_w": jnp.ones((1, HIDDEN), jnp.float32),
        "head_w": dense_f32(HIDDEN, CODEC_VOCAB).astype(jnp.bfloat16),
    }


# TODO(synk): generate()/token2wav/soundfile output and the ONNX/embedding
# export paths are host-side I/O + autoregressive driver code, not kernel
# compute; only the forward() pass is implemented here.
# TODO(synk): for real (non-synthetic) Talker dims on v7x, stream per-layer
# weights with a grid over layers + pl.Buffered BlockSpecs instead of the
# fully-resident monolithic design, and grid query tiles to use both TCs.

if __name__ == "__main__":
    root = jax.random.PRNGKey(0)
    pkey, xkey = jax.random.split(root)
    params = init_params(pkey)

    fwd = jax.jit(talker_forward)

    # ---------------- prefill: seq_len = 8, empty KV cache ----------------
    S = 8
    inputs_embeds = jax.random.normal(xkey, (1, S, INPUT_HIDDEN), jnp.float32)
    # get_position_ids(): stack([arange(S)[None]] * 3) -> [3, 1, S]
    position_ids = jnp.stack([jnp.arange(S, dtype=jnp.int32)[None, :]] * 3)
    # get_attention_mask(): (1 - tril) * finfo(float32).min -> [1, 1, S, S]
    attention_mask = ((1.0 - jnp.tril(jnp.ones((1, 1, S, S), jnp.float32)))
                      * jnp.finfo(jnp.float32).min)
    # empty KV cache, matching export shape [L, 2, 1, 0, Hkv, Dh]
    past_key_values = jnp.zeros(
        (NUM_LAYERS, 2, 1, 0, NUM_KV_HEADS, HEAD_DIM), jnp.float32)

    logits, presents = fwd(params, inputs_embeds, attention_mask,
                           position_ids, past_key_values)
    jax.block_until_ready((logits, presents))
    assert logits.shape == (1, CODEC_VOCAB)
    assert presents.shape == (NUM_LAYERS, 2, 1, S, NUM_KV_HEADS, HEAD_DIM)
    assert bool(jnp.all(jnp.isfinite(logits)))
    assert bool(jnp.all(jnp.isfinite(presents)))

    # ---------------- one decode step: token_len > 0, past length = S -------
    dec_embeds = jax.random.normal(jax.random.PRNGKey(1),
                                   (1, 1, INPUT_HIDDEN), jnp.float32)
    dec_position_ids = jnp.stack([jnp.full((1, 1), S, dtype=jnp.int32)] * 3)
    dec_mask = jnp.zeros((1, 1, 1, S + 1), jnp.float32)
    logits2, presents2 = fwd(params, dec_embeds, dec_mask,
                             dec_position_ids, presents)
    jax.block_until_ready((logits2, presents2))
    assert logits2.shape == (1, CODEC_VOCAB)
    assert presents2.shape == (NUM_LAYERS, 2, 1, S + 1, NUM_KV_HEADS, HEAD_DIM)
    assert bool(jnp.all(jnp.isfinite(logits2)))
    assert bool(jnp.all(jnp.isfinite(presents2)))

    print("KERNEL_OK")
</pallas_src>

<mosaic_0001>
module attributes {stable_mosaic.version = 11 : i64} {
  func.func @_talker_fused_kernel(%arg0: memref<8x48xf32, #tpu.memory_space<vmem>>, %arg1: memref<8x64xf32, #tpu.memory_space<vmem>>, %arg2: memref<8x64xf32, #tpu.memory_space<vmem>>, %arg3: memref<64x64xbf16, #tpu.memory_space<vmem>>, %arg4: memref<32x32xbf16, #tpu.memory_space<vmem>>, %arg5: memref<48x64xbf16, #tpu.memory_space<vmem>>, %arg6: memref<1x64xf32, #tpu.memory_space<vmem>>, %arg7: memref<2x1x64xf32, #tpu.memory_space<vmem>>, %arg8: memref<2x64x128xbf16, #tpu.memory_space<vmem>>, %arg9: memref<2x1x128xf32, #tpu.memory_space<vmem>>, %arg10: memref<2x64x64xbf16, #tpu.memory_space<vmem>>, %arg11: memref<2x1x64xf32, #tpu.memory_space<vmem>>, %arg12: memref<2x64x256xbf16, #tpu.memory_space<vmem>>, %arg13: memref<2x128x64xbf16, #tpu.memory_space<vmem>>, %arg14: memref<1x64xf32, #tpu.memory_space<vmem>>, %arg15: memref<64x32xbf16, #tpu.memory_space<vmem>>, %arg16: memref<1x32xf32, #tpu.memory_space<vmem>>, %arg17: memref<8x128xf32, #tpu.memory_space<vmem>>) attributes {dimension_semantics = [], scalar_prefetch = 0 : i64, scratch_operands = 0 : i64, tpu.core_type = #tpu.core_type<tc>} {
    %c0 = arith.constant 0 : index
    %c0_0 = arith.constant 0 : index
    %0 = vector.load %arg0[%c0, %c0_0] : memref<8x48xf32, #tpu.memory_space<vmem>>, vector<8x48xf32>
    %c0_1 = arith.constant 0 : index
    %c0_2 = arith.constant 0 : index
    %1 = vector.load %arg5[%c0_1, %c0_2] : memref<48x64xbf16, #tpu.memory_space<vmem>>, vector<48x64xbf16>
    %2 = arith.truncf %0 : vector<8x48xf32> to vector<8x48xbf16>
    %cst = arith.constant dense<0.000000e+00> : vector<8x64xf32>
    %3 = tpu.matmul %2, %1, %cst {dimension_numbers = #tpu.dot_dimension_numbers<[1], [0], [0], [1], [0, 0, 1, 1], [], []>} : vector<8x48xbf16>, vector<48x64xbf16>, vector<8x64xf32> -> vector<8x64xf32>
    %c0_3 = arith.constant 0 : index
    %c0_4 = arith.constant 0 : index
    %4 = vector.load %arg6[%c0_3, %c0_4] : memref<1x64xf32, #tpu.memory_space<vmem>>, vector<1x64xf32>
    %5 = vector.broadcast %4 : vector<1x64xf32> to vector<8x64xf32>
    %6 = arith.addf %3, %5 : vector<8x64xf32>
    %c0_5 = arith.constant 0 : index
    %c0_6 = arith.constant 0 : index
    %7 = vector.load %arg1[%c0_5, %c0_6] : memref<8x64xf32, #tpu.memory_space<vmem>>, vector<8x64xf32>
    %c0_7 = arith.constant 0 : index
    %c0_8 = arith.constant 0 : index
    %8 = vector.load %arg2[%c0_7, %c0_8] : memref<8x64xf32, #tpu.memory_space<vmem>>, vector<8x64xf32>
    %9 = vector.extract_strided_slice %7 {offsets = [0, 0], sizes = [8, 32], strides = [1, 1]} : vector<8x64xf32> to vector<8x32xf32>
    %10 = vector.extract_strided_slice %8 {offsets = [0, 0], sizes = [8, 32], strides = [1, 1]} : vector<8x64xf32> to vector<8x32xf32>
    %c0_9 = arith.constant 0 : index
    %c0_10 = arith.constant 0 : index
    %11 = vector.load %arg3[%c0_9, %c0_10] : memref<64x64xbf16, #tpu.memory_space<vmem>>, vector<64x64xbf16>
    %c0_11 = arith.constant 0 : index
    %c0_12 = arith.constant 0 : index
    %12 = vector.load %arg4[%c0_11, %c0_12] : memref<32x32xbf16, #tpu.memory_space<vmem>>, vector<32x32xbf16>
    %13 = tpu.iota {dimensions = array<i32: 0>} : vector<8x8xi32>
    %c0_i32 = arith.constant 0 : i32
    %14 = vector.broadcast %c0_i32 : i32 to vector<8x8xi32>
    %15 = arith.addi %13, %14 : vector<8x8xi32>
    %16 = tpu.iota {dimensions = array<i32: 1>} : vector<8x8xi32>
    %17 = arith.cmpi sle, %16, %15 : vector<8x8xi32>
    %cst_13 = arith.constant 0.000000e+00 : f32
    %cst_14 = arith.constant -3.40282347E+38 : f32
    %18 = vector.broadcast %cst_13 : f32 to vector<8x8xf32>
    %19 = vector.broadcast %cst_14 : f32 to vector<8x8xf32>
    %20 = arith.select %17, %18, %19 : vector<8x8xi1>, vector<8x8xf32>
    %c0_15 = arith.constant 0 : index
    %c0_16 = arith.constant 0 : index
    %c0_17 = arith.constant 0 : index
    %21 = vector.load %arg7[%c0_15, %c0_16, %c0_17] : memref<2x1x64xf32, #tpu.memory_space<vmem>>, vector<1x1x64xf32>
    %22 = vector.shape_cast %21 : vector<1x1x64xf32> to vector<1x64xf32>
    %23 = arith.mulf %6, %6 : vector<8x64xf32>
    %cst_18 = arith.constant dense<0.000000e+00> : vector<8xf32>
    %24 = vector.multi_reduction <add>, %23, %cst_18 [1] : vector<8x64xf32> to vector<8xf32>
    %25 = vector.shape_cast %24 : vector<8xf32> to vector<8x1xf32>
    %cst_19 = arith.constant 6.400000e+01 : f32
    %26 = vector.broadcast %cst_19 : f32 to vector<8x1xf32>
    %27 = arith.divf %25, %26 : vector<8x1xf32>
    %cst_20 = arith.constant 9.99999997E-7 : f32
    %28 = vector.broadcast %cst_20 : f32 to vector<8x1xf32>
    %29 = arith.addf %27, %28 : vector<8x1xf32>
    %30 = math.rsqrt %29 : vector<8x1xf32>
    %31 = vector.broadcast %30 : vector<8x1xf32> to vector<8x64xf32>
    %32 = arith.mulf %6, %31 : vector<8x64xf32>
    %33 = vector.broadcast %22 : vector<1x64xf32> to vector<8x64xf32>
    %34 = arith.mulf %32, %33 : vector<8x64xf32>
    %c0_21 = arith.constant 0 : index
    %c0_22 = arith.constant 0 : index
    %c0_23 = arith.constant 0 : index
    %35 = vector.load %arg8[%c0_21, %c0_22, %c0_23] : memref<2x64x128xbf16, #tpu.memory_space<vmem>>, vector<1x64x128xbf16>
    %36 = vector.shape_cast %35 : vector<1x64x128xbf16> to vector<64x128xbf16>
    %37 = arith.truncf %34 : vector<8x64xf32> to vector<8x64xbf16>
    %cst_24 = arith.constant dense<0.000000e+00> : vector<8x128xf32>
    %38 = tpu.matmul %37, %36, %cst_24 {dimension_numbers = #tpu.dot_dimension_numbers<[1], [0], [0], [1], [0, 0, 1, 1], [], []>} : vector<8x64xbf16>, vector<64x128xbf16>, vector<8x128xf32> -> vector<8x128xf32>
    %c0_25 = arith.constant 0 : index
    %c0_26 = arith.constant 0 : index
    %c0_27 = arith.constant 0 : index
    %39 = vector.load %arg9[%c0_25, %c0_26, %c0_27] : memref<2x1x128xf32, #tpu.memory_space<vmem>>, vector<1x1x128xf32>
    %40 = vector.shape_cast %39 : vector<1x1x128xf32> to vector<1x128xf32>
    %41 = vector.broadcast %40 : vector<1x128xf32> to vector<8x128xf32>
    %42 = arith.addf %38, %41 : vector<8x128xf32>
    %43 = vector.extract_strided_slice %42 {offsets = [0, 0], sizes = [8, 64], strides = [1, 1]} : vector<8x128xf32> to vector<8x64xf32>
    %44 = vector.extract_strided_slice %42 {offsets = [0, 64], sizes = [8, 32], strides = [1, 1]} : vector<8x128xf32> to vector<8x32xf32>
    %45 = vector.extract_strided_slice %42 {offsets = [0, 96], sizes = [8, 32], strides = [1, 1]} : vector<8x128xf32> to vector<8x32xf32>
    %46 = arith.mulf %43, %7 : vector<8x64xf32>
    %47 = arith.truncf %43 : vector<8x64xf32> to vector<8x64xbf16>
    %cst_28 = arith.constant dense<0.000000e+00> : vector<8x64xf32>
    %48 = tpu.matmul %47, %11, %cst_28 {dimension_numbers = #tpu.dot_dimension_numbers<[1], [0], [0], [1], [0, 0, 1, 1], [], []>} : vector<8x64xbf16>, vector<64x64xbf16>, vector<8x64xf32> -> vector<8x64xf32>
    %49 = arith.mulf %48, %8 : vector<8x64xf32>
    %50 = arith.addf %46, %49 : vector<8x64xf32>
    %51 = arith.mulf %44, %9 : vector<8x32xf32>
    %52 = arith.truncf %44 : vector<8x32xf32> to vector<8x32xbf16>
    %cst_29 = arith.constant dense<0.000000e+00> : vector<8x32xf32>
    %53 = tpu.matmul %52, %12, %cst_29 {dimension_numbers = #tpu.dot_dimension_numbers<[1], [0], [0], [1], [0, 0, 1, 1], [], []>} : vector<8x32xbf16>, vector<32x32xbf16>, vector<8x32xf32> -> vector<8x32xf32>
    %54 = arith.mulf %53, %10 : vector<8x32xf32>
    %55 = arith.addf %51, %54 : vector<8x32xf32>
    %56 = vector.extract_strided_slice %50 {offsets = [0, 0], sizes = [8, 16], strides = [1, 1]} : vector<8x64xf32> to vector<8x16xf32>
    %57 = vector.extract_strided_slice %55 {offsets = [0, 0], sizes = [8, 16], strides = [1, 1]} : vector<8x32xf32> to vector<8x16xf32>
    %58 = vector.extract_strided_slice %45 {offsets = [0, 0], sizes = [8, 16], strides = [1, 1]} : vector<8x32xf32> to vector<8x16xf32>
    %59 = arith.truncf %56 : vector<8x16xf32> to vector<8x16xbf16>
    %60 = arith.truncf %57 : vector<8x16xf32> to vector<8x16xbf16>
    %cst_30 = arith.constant dense<0.000000e+00> : vector<8x8xf32>
    %61 = tpu.matmul %59, %60, %cst_30 {dimension_numbers = #tpu.dot_dimension_numbers<[1], [1], [0], [0], [0, 0, 1, 0], [], []>} : vector<8x16xbf16>, vector<8x16xbf16>, vector<8x8xf32> -> vector<8x8xf32>
    %62 = arith.addf %61, %20 : vector<8x8xf32>
    %cst_31 = arith.constant dense<0xFF800000> : vector<8xf32>
    %63 = vector.multi_reduction <maximumf>, %62, %cst_31 [1] : vector<8x8xf32> to vector<8xf32>
    %64 = vector.shape_cast %63 : vector<8xf32> to vector<8x1xf32>
    %65 = vector.broadcast %64 : vector<8x1xf32> to vector<8x8xf32>
    %66 = arith.subf %62, %65 : vector<8x8xf32>
    %67 = math.exp %66 : vector<8x8xf32>
    %cst_32 = arith.constant dense<0.000000e+00> : vector<8xf32>
    %68 = vector.multi_reduction <add>, %67, %cst_32 [1] : vector<8x8xf32> to vector<8xf32>
    %69 = vector.shape_cast %68 : vector<8xf32> to vector<8x1xf32>
    %70 = tpu.reciprocal %69 {approx = true} : vector<8x1xf32> -> vector<8x1xf32>
    %71 = vector.broadcast %70 : vector<8x1xf32> to vector<8x8xf32>
    %72 = arith.mulf %67, %71 : vector<8x8xf32>
    %73 = arith.truncf %72 : vector<8x8xf32> to vector<8x8xbf16>
    %74 = arith.truncf %58 : vector<8x16xf32> to vector<8x16xbf16>
    %cst_33 = arith.constant dense<0.000000e+00> : vector<8x16xf32>
    %75 = tpu.matmul %73, %74, %cst_33 {dimension_numbers = #tpu.dot_dimension_numbers<[1], [0], [0], [1], [0, 0, 1, 1], [], []>} : vector<8x8xbf16>, vector<8x16xbf16>, vector<8x16xf32> -> vector<8x16xf32>
    %76 = vector.extract_strided_slice %50 {offsets = [0, 16], sizes = [8, 16], strides = [1, 1]} : vector<8x64xf32> to vector<8x16xf32>
    %77 = vector.extract_strided_slice %55 {offsets = [0, 0], sizes = [8, 16], strides = [1, 1]} : vector<8x32xf32> to vector<8x16xf32>
    %78 = vector.extract_strided_slice %45 {offsets = [0, 0], sizes = [8, 16], strides = [1, 1]} : vector<8x32xf32> to vector<8x16xf32>
    %79 = arith.truncf %76 : vector<8x16xf32> to vector<8x16xbf16>
    %80 = arith.truncf %77 : vector<8x16xf32> to vector<8x16xbf16>
    %cst_34 = arith.constant dense<0.000000e+00> : vector<8x8xf32>
    %81 = tpu.matmul %79, %80, %cst_34 {dimension_numbers = #tpu.dot_dimension_numbers<[1], [1], [0], [0], [0, 0, 1, 0], [], []>} : vector<8x16xbf16>, vector<8x16xbf16>, vector<8x8xf32> -> vector<8x8xf32>
    %82 = arith.addf %81, %20 : vector<8x8xf32>
    %cst_35 = arith.constant dense<0xFF800000> : vector<8xf32>
    %83 = vector.multi_reduction <maximumf>, %82, %cst_35 [1] : vector<8x8xf32> to vector<8xf32>
    %84 = vector.shape_cast %83 : vector<8xf32> to vector<8x1xf32>
    %85 = vector.broadcast %84 : vector<8x1xf32> to vector<8x8xf32>
    %86 = arith.subf %82, %85 : vector<8x8xf32>
    %87 = math.exp %86 : vector<8x8xf32>
    %cst_36 = arith.constant dense<0.000000e+00> : vector<8xf32>
    %88 = vector.multi_reduction <add>, %87, %cst_36 [1] : vector<8x8xf32> to vector<8xf32>
    %89 = vector.shape_cast %88 : vector<8xf32> to vector<8x1xf32>
    %90 = tpu.reciprocal %89 {approx = true} : vector<8x1xf32> -> vector<8x1xf32>
    %91 = vector.broadcast %90 : vector<8x1xf32> to vector<8x8xf32>
    %92 = arith.mulf %87, %91 : vector<8x8xf32>
    %93 = arith.truncf %92 : vector<8x8xf32> to vector<8x8xbf16>
    %94 = arith.truncf %78 : vector<8x16xf32> to vector<8x16xbf16>
    %cst_37 = arith.constant dense<0.000000e+00> : vector<8x16xf32>
    %95 = tpu.matmul %93, %94, %cst_37 {dimension_numbers = #tpu.dot_dimension_numbers<[1], [0], [0], [1], [0, 0, 1, 1], [], []>} : vector<8x8xbf16>, vector<8x16xbf16>, vector<8x16xf32> -> vector<8x16xf32>
    %96 = vector.extract_strided_slice %50 {offsets = [0, 32], sizes = [8, 16], strides = [1, 1]} : vector<8x64xf32> to vector<8x16xf32>
    %97 = vector.extract_strided_slice %55 {offsets = [0, 16], sizes = [8, 16], strides = [1, 1]} : vector<8x32xf32> to vector<8x16xf32>
    %98 = vector.extract_strided_slice %45 {offsets = [0, 16], sizes = [8, 16], strides = [1, 1]} : vector<8x32xf32> to vector<8x16xf32>
    %99 = arith.truncf %96 : vector<8x16xf32> to vector<8x16xbf16>
    %100 = arith.truncf %97 : vector<8x16xf32> to vector<8x16xbf16>
    %cst_38 = arith.constant dense<0.000000e+00> : vector<8x8xf32>
    %101 = tpu.matmul %99, %100, %cst_38 {dimension_numbers = #tpu.dot_dimension_numbers<[1], [1], [0], [0], [0, 0, 1, 0], [], []>} : vector<8x16xbf16>, vector<8x16xbf16>, vector<8x8xf32> -> vector<8x8xf32>
    %102 = arith.addf %101, %20 : vector<8x8xf32>
    %cst_39 = arith.constant dense<0xFF800000> : vector<8xf32>
    %103 = vector.multi_reduction <maximumf>, %102, %cst_39 [1] : vector<8x8xf32> to vector<8xf32>
    %104 = vector.shape_cast %103 : vector<8xf32> to vector<8x1xf32>
    %105 = vector.broadcast %104 : vector<8x1xf32> to vector<8x8xf32>
    %106 = arith.subf %102, %105 : vector<8x8xf32>
    %107 = math.exp %106 : vector<8x8xf32>
    %cst_40 = arith.constant dense<0.000000e+00> : vector<8xf32>
    %108 = vector.multi_reduction <add>, %107, %cst_40 [1] : vector<8x8xf32> to vector<8xf32>
    %109 = vector.shape_cast %108 : vector<8xf32> to vector<8x1xf32>
    %110 = tpu.reciprocal %109 {approx = true} : vector<8x1xf32> -> vector<8x1xf32>
    %111 = vector.broadcast %110 : vector<8x1xf32> to vector<8x8xf32>
    %112 = arith.mulf %107, %111 : vector<8x8xf32>
    %113 = arith.truncf %112 : vector<8x8xf32> to vector<8x8xbf16>
    %114 = arith.truncf %98 : vector<8x16xf32> to vector<8x16xbf16>
    %cst_41 = arith.constant dense<0.000000e+00> : vector<8x16xf32>
    %115 = tpu.matmul %113, %114, %cst_41 {dimension_numbers = #tpu.dot_dimension_numbers<[1], [0], [0], [1], [0, 0, 1, 1], [], []>} : vector<8x8xbf16>, vector<8x16xbf16>, vector<8x16xf32> -> vector<8x16xf32>
    %116 = vector.extract_strided_slice %50 {offsets = [0, 48], sizes = [8, 16], strides = [1, 1]} : vector<8x64xf32> to vector<8x16xf32>
    %117 = vector.extract_strided_slice %55 {offsets = [0, 16], sizes = [8, 16], strides = [1, 1]} : vector<8x32xf32> to vector<8x16xf32>
    %118 = vector.extract_strided_slice %45 {offsets = [0, 16], sizes = [8, 16], strides = [1, 1]} : vector<8x32xf32> to vector<8x16xf32>
    %119 = arith.truncf %116 : vector<8x16xf32> to vector<8x16xbf16>
    %120 = arith.truncf %117 : vector<8x16xf32> to vector<8x16xbf16>
    %cst_42 = arith.constant dense<0.000000e+00> : vector<8x8xf32>
    %121 = tpu.matmul %119, %120, %cst_42 {dimension_numbers = #tpu.dot_dimension_numbers<[1], [1], [0], [0], [0, 0, 1, 0], [], []>} : vector<8x16xbf16>, vector<8x16xbf16>, vector<8x8xf32> -> vector<8x8xf32>
    %122 = arith.addf %121, %20 : vector<8x8xf32>
    %cst_43 = arith.constant dense<0xFF800000> : vector<8xf32>
    %123 = vector.multi_reduction <maximumf>, %122, %cst_43 [1] : vector<8x8xf32> to vector<8xf32>
    %124 = vector.shape_cast %123 : vector<8xf32> to vector<8x1xf32>
    %125 = vector.broadcast %124 : vector<8x1xf32> to vector<8x8xf32>
    %126 = arith.subf %122, %125 : vector<8x8xf32>
    %127 = math.exp %126 : vector<8x8xf32>
    %cst_44 = arith.constant dense<0.000000e+00> : vector<8xf32>
    %128 = vector.multi_reduction <add>, %127, %cst_44 [1] : vector<8x8xf32> to vector<8xf32>
    %129 = vector.shape_cast %128 : vector<8xf32> to vector<8x1xf32>
    %130 = tpu.reciprocal %129 {approx = true} : vector<8x1xf32> -> vector<8x1xf32>
    %131 = vector.broadcast %130 : vector<8x1xf32> to vector<8x8xf32>
    %132 = arith.mulf %127, %131 : vector<8x8xf32>
    %133 = arith.truncf %132 : vector<8x8xf32> to vector<8x8xbf16>
    %134 = arith.truncf %118 : vector<8x16xf32> to vector<8x16xbf16>
    %cst_45 = arith.constant dense<0.000000e+00> : vector<8x16xf32>
    %135 = tpu.matmul %133, %134, %cst_45 {dimension_numbers = #tpu.dot_dimension_numbers<[1], [0], [0], [1], [0, 0, 1, 1], [], []>} : vector<8x8xbf16>, vector<8x16xbf16>, vector<8x16xf32> -> vector<8x16xf32>
    %136 = tpu.concatenate %75, %95, %115, %135 in 1 : vector<8x16xf32>, vector<8x16xf32>, vector<8x16xf32>, vector<8x16xf32> -> vector<8x64xf32>
    %c0_46 = arith.constant 0 : index
    %c0_47 = arith.constant 0 : index
    %c0_48 = arith.constant 0 : index
    %137 = vector.load %arg10[%c0_46, %c0_47, %c0_48] : memref<2x64x64xbf16, #tpu.memory_space<vmem>>, vector<1x64x64xbf16>
    %138 = vector.shape_cast %137 : vector<1x64x64xbf16> to vector<64x64xbf16>
    %139 = arith.truncf %136 : vector<8x64xf32> to vector<8x64xbf16>
    %cst_49 = arith.constant dense<0.000000e+00> : vector<8x64xf32>
    %140 = tpu.matmul %139, %138, %cst_49 {dimension_numbers = #tpu.dot_dimension_numbers<[1], [0], [0], [1], [0, 0, 1, 1], [], []>} : vector<8x64xbf16>, vector<64x64xbf16>, vector<8x64xf32> -> vector<8x64xf32>
    %141 = arith.addf %6, %140 : vector<8x64xf32>
    %c0_50 = arith.constant 0 : index
    %c0_51 = arith.constant 0 : index
    %c0_52 = arith.constant 0 : index
    %142 = vector.load %arg11[%c0_50, %c0_51, %c0_52] : memref<2x1x64xf32, #tpu.memory_space<vmem>>, vector<1x1x64xf32>
    %143 = vector.shape_cast %142 : vector<1x1x64xf32> to vector<1x64xf32>
    %144 = arith.mulf %141, %141 : vector<8x64xf32>
    %cst_53 = arith.constant dense<0.000000e+00> : vector<8xf32>
    %145 = vector.multi_reduction <add>, %144, %cst_53 [1] : vector<8x64xf32> to vector<8xf32>
    %146 = vector.shape_cast %145 : vector<8xf32> to vector<8x1xf32>
    %cst_54 = arith.constant 6.400000e+01 : f32
    %147 = vector.broadcast %cst_54 : f32 to vector<8x1xf32>
    %148 = arith.divf %146, %147 : vector<8x1xf32>
    %cst_55 = arith.constant 9.99999997E-7 : f32
    %149 = vector.broadcast %cst_55 : f32 to vector<8x1xf32>
    %150 = arith.addf %148, %149 : vector<8x1xf32>
    %151 = math.rsqrt %150 : vector<8x1xf32>
    %152 = vector.broadcast %151 : vector<8x1xf32> to vector<8x64xf32>
    %153 = arith.mulf %141, %152 : vector<8x64xf32>
    %154 = vector.broadcast %143 : vector<1x64xf32> to vector<8x64xf32>
    %155 = arith.mulf %153, %154 : vector<8x64xf32>
    %c0_56 = arith.constant 0 : index
    %c0_57 = arith.constant 0 : index
    %c0_58 = arith.constant 0 : index
    %156 = vector.load %arg12[%c0_56, %c0_57, %c0_58] : memref<2x64x256xbf16, #tpu.memory_space<vmem>>, vector<1x64x256xbf16>
    %157 = vector.shape_cast %156 : vector<1x64x256xbf16> to vector<64x256xbf16>
    %158 = arith.truncf %155 : vector<8x64xf32> to vector<8x64xbf16>
    %cst_59 = arith.constant dense<0.000000e+00> : vector<8x256xf32>
    %159 = tpu.matmul %158, %157, %cst_59 {dimension_numbers = #tpu.dot_dimension_numbers<[1], [0], [0], [1], [0, 0, 1, 1], [], []>} : vector<8x64xbf16>, vector<64x256xbf16>, vector<8x256xf32> -> vector<8x256xf32>
    %160 = vector.extract_strided_slice %159 {offsets = [0, 0], sizes = [8, 128], strides = [1, 1]} : vector<8x256xf32> to vector<8x128xf32>
    %161 = vector.extract_strided_slice %159 {offsets = [0, 128], sizes = [8, 128], strides = [1, 1]} : vector<8x256xf32> to vector<8x128xf32>
    %162 = arith.negf %160 : vector<8x128xf32>
    %163 = math.exp %162 : vector<8x128xf32>
    %cst_60 = arith.constant 1.000000e+00 : f32
    %164 = vector.broadcast %cst_60 : f32 to vector<8x128xf32>
    %165 = arith.addf %164, %163 : vector<8x128xf32>
    %166 = arith.divf %164, %165 : vector<8x128xf32>
    %167 = arith.mulf %160, %166 : vector<8x128xf32>
    %168 = arith.mulf %167, %161 : vector<8x128xf32>
    %c0_61 = arith.constant 0 : index
    %c0_62 = arith.constant 0 : index
    %c0_63 = arith.constant 0 : index
    %169 = vector.load %arg13[%c0_61, %c0_62, %c0_63] : memref<2x128x64xbf16, #tpu.memory_space<vmem>>, vector<1x128x64xbf16>
    %170 = vector.shape_cast %169 : vector<1x128x64xbf16> to vector<128x64xbf16>
    %171 = arith.truncf %168 : vector<8x128xf32> to vector<8x128xbf16>
    %cst_64 = arith.constant dense<0.000000e+00> : vector<8x64xf32>
    %172 = tpu.matmul %171, %170, %cst_64 {dimension_numbers = #tpu.dot_dimension_numbers<[1], [0], [0], [1], [0, 0, 1, 1], [], []>} : vector<8x128xbf16>, vector<128x64xbf16>, vector<8x64xf32> -> vector<8x64xf32>
    %173 = arith.addf %141, %172 : vector<8x64xf32>
    %c1 = arith.constant 1 : index
    %c0_65 = arith.constant 0 : index
    %c0_66 = arith.constant 0 : index
    %174 = vector.load %arg7[%c1, %c0_65, %c0_66] : memref<2x1x64xf32, #tpu.memory_space<vmem>>, vector<1x1x64xf32>
    %175 = vector.shape_cast %174 : vector<1x1x64xf32> to vector<1x64xf32>
    %176 = arith.mulf %173, %173 : vector<8x64xf32>
    %cst_67 = arith.constant dense<0.000000e+00> : vector<8xf32>
    %177 = vector.multi_reduction <add>, %176, %cst_67 [1] : vector<8x64xf32> to vector<8xf32>
    %178 = vector.shape_cast %177 : vector<8xf32> to vector<8x1xf32>
    %cst_68 = arith.constant 6.400000e+01 : f32
    %179 = vector.broadcast %cst_68 : f32 to vector<8x1xf32>
    %180 = arith.divf %178, %179 : vector<8x1xf32>
    %cst_69 = arith.constant 9.99999997E-7 : f32
    %181 = vector.broadcast %cst_69 : f32 to vector<8x1xf32>
    %182 = arith.addf %180, %181 : vector<8x1xf32>
    %183 = math.rsqrt %182 : vector<8x1xf32>
    %184 = vector.broadcast %183 : vector<8x1xf32> to vector<8x64xf32>
    %185 = arith.mulf %173, %184 : vector<8x64xf32>
    %186 = vector.broadcast %175 : vector<1x64xf32> to vector<8x64xf32>
    %187 = arith.mulf %185, %186 : vector<8x64xf32>
    %c1_70 = arith.constant 1 : index
    %c0_71 = arith.constant 0 : index
    %c0_72 = arith.constant 0 : index
    %188 = vector.load %arg8[%c1_70, %c0_71, %c0_72] : memref<2x64x128xbf16, #tpu.memory_space<vmem>>, vector<1x64x128xbf16>
    %189 = vector.shape_cast %188 : vector<1x64x128xbf16> to vector<64x128xbf16>
    %190 = arith.truncf %187 : vector<8x64xf32> to vector<8x64xbf16>
    %cst_73 = arith.constant dense<0.000000e+00> : vector<8x128xf32>
    %191 = tpu.matmul %190, %189, %cst_73 {dimension_numbers = #tpu.dot_dimension_numbers<[1], [0], [0], [1], [0, 0, 1, 1], [], []>} : vector<8x64xbf16>, vector<64x128xbf16>, vector<8x128xf32> -> vector<8x128xf32>
    %c1_74 = arith.constant 1 : index
    %c0_75 = arith.constant 0 : index
    %c0_76 = arith.constant 0 : index
    %192 = vector.load %arg9[%c1_74, %c0_75, %c0_76] : memref<2x1x128xf32, #tpu.memory_space<vmem>>, vector<1x1x128xf32>
    %193 = vector.shape_cast %192 : vector<1x1x128xf32> to vector<1x128xf32>
    %194 = vector.broadcast %193 : vector<1x128xf32> to vector<8x128xf32>
    %195 = arith.addf %191, %194 : vector<8x128xf32>
    %196 = vector.extract_strided_slice %195 {offsets = [0, 0], sizes = [8, 64], strides = [1, 1]} : vector<8x128xf32> to vector<8x64xf32>
    %197 = vector.extract_strided_slice %195 {offsets = [0, 64], sizes = [8, 32], strides = [1, 1]} : vector<8x128xf32> to vector<8x32xf32>
    %198 = vector.extract_strided_slice %195 {offsets = [0, 96], sizes = [8, 32], strides = [1, 1]} : vector<8x128xf32> to vector<8x32xf32>
    %199 = arith.mulf %196, %7 : vector<8x64xf32>
    %200 = arith.truncf %196 : vector<8x64xf32> to vector<8x64xbf16>
    %cst_77 = arith.constant dense<0.000000e+00> : vector<8x64xf32>
    %201 = tpu.matmul %200, %11, %cst_77 {dimension_numbers = #tpu.dot_dimension_numbers<[1], [0], [0], [1], [0, 0, 1, 1], [], []>} : vector<8x64xbf16>, vector<64x64xbf16>, vector<8x64xf32> -> vector<8x64xf32>
    %202 = arith.mulf %201, %8 : vector<8x64xf32>
    %203 = arith.addf %199, %202 : vector<8x64xf32>
    %204 = arith.mulf %197, %9 : vector<8x32xf32>
    %205 = arith.truncf %197 : vector<8x32xf32> to vector<8x32xbf16>
    %cst_78 = arith.constant dense<0.000000e+00> : vector<8x32xf32>
    %206 = tpu.matmul %205, %12, %cst_78 {dimension_numbers = #tpu.dot_dimension_numbers<[1], [0], [0], [1], [0, 0, 1, 1], [], []>} : vector<8x32xbf16>, vector<32x32xbf16>, vector<8x32xf32> -> vector<8x32xf32>
    %207 = arith.mulf %206, %10 : vector<8x32xf32>
    %208 = arith.addf %204, %207 : vector<8x32xf32>
    %209 = vector.extract_strided_slice %203 {offsets = [7, 0], sizes = [1, 64], strides = [1, 1]} : vector<8x64xf32> to vector<1x64xf32>
    %210 = vector.extract_strided_slice %173 {offsets = [7, 0], sizes = [1, 64], strides = [1, 1]} : vector<8x64xf32> to vector<1x64xf32>
    %211 = vector.extract_strided_slice %209 {offsets = [0, 0], sizes = [1, 16], strides = [1, 1]} : vector<1x64xf32> to vector<1x16xf32>
    %212 = vector.extract_strided_slice %208 {offsets = [0, 0], sizes = [8, 16], strides = [1, 1]} : vector<8x32xf32> to vector<8x16xf32>
    %213 = vector.extract_strided_slice %198 {offsets = [0, 0], sizes = [8, 16], strides = [1, 1]} : vector<8x32xf32> to vector<8x16xf32>
    %214 = arith.truncf %211 : vector<1x16xf32> to vector<1x16xbf16>
    %215 = arith.truncf %212 : vector<8x16xf32> to vector<8x16xbf16>
    %cst_79 = arith.constant dense<0.000000e+00> : vector<1x8xf32>
    %216 = tpu.matmul %214, %215, %cst_79 {dimension_numbers = #tpu.dot_dimension_numbers<[1], [1], [0], [0], [0, 0, 1, 0], [], []>} : vector<1x16xbf16>, vector<8x16xbf16>, vector<1x8xf32> -> vector<1x8xf32>
    %cst_80 = arith.constant dense<0xFF800000> : vector<1xf32>
    %217 = vector.multi_reduction <maximumf>, %216, %cst_80 [1] : vector<1x8xf32> to vector<1xf32>
    %218 = vector.shape_cast %217 : vector<1xf32> to vector<1x1xf32>
    %219 = vector.broadcast %218 : vector<1x1xf32> to vector<1x8xf32>
    %220 = arith.subf %216, %219 : vector<1x8xf32>
    %221 = math.exp %220 : vector<1x8xf32>
    %cst_81 = arith.constant dense<0.000000e+00> : vector<1xf32>
    %222 = vector.multi_reduction <add>, %221, %cst_81 [1] : vector<1x8xf32> to vector<1xf32>
    %223 = vector.shape_cast %222 : vector<1xf32> to vector<1x1xf32>
    %224 = tpu.reciprocal %223 {approx = true} : vector<1x1xf32> -> vector<1x1xf32>
    %225 = vector.broadcast %224 : vector<1x1xf32> to vector<1x8xf32>
    %226 = arith.mulf %221, %225 : vector<1x8xf32>
    %227 = arith.truncf %226 : vector<1x8xf32> to vector<1x8xbf16>
    %228 = arith.truncf %213 : vector<8x16xf32> to vector<8x16xbf16>
    %cst_82 = arith.constant dense<0.000000e+00> : vector<1x16xf32>
    %229 = tpu.matmul %227, %228, %cst_82 {dimension_numbers = #tpu.dot_dimension_numbers<[1], [0], [0], [1], [0, 0, 1, 1], [], []>} : vector<1x8xbf16>, vector<8x16xbf16>, vector<1x16xf32> -> vector<1x16xf32>
    %230 = vector.extract_strided_slice %209 {offsets = [0, 16], sizes = [1, 16], strides = [1, 1]} : vector<1x64xf32> to vector<1x16xf32>
    %231 = vector.extract_strided_slice %208 {offsets = [0, 0], sizes = [8, 16], strides = [1, 1]} : vector<8x32xf32> to vector<8x16xf32>
    %232 = vector.extract_strided_slice %198 {offsets = [0, 0], sizes = [8, 16], strides = [1, 1]} : vector<8x32xf32> to vector<8x16xf32>
    %233 = arith.truncf %230 : vector<1x16xf32> to vector<1x16xbf16>
    %234 = arith.truncf %231 : vector<8x16xf32> to vector<8x16xbf16>
    %cst_83 = arith.constant dense<0.000000e+00> : vector<1x8xf32>
    %235 = tpu.matmul %233, %234, %cst_83 {dimension_numbers = #tpu.dot_dimension_numbers<[1], [1], [0], [0], [0, 0, 1, 0], [], []>} : vector<1x16xbf16>, vector<8x16xbf16>, vector<1x8xf32> -> vector<1x8xf32>
    %cst_84 = arith.constant dense<0xFF800000> : vector<1xf32>
    %236 = vector.multi_reduction <maximumf>, %235, %cst_84 [1] : vector<1x8xf32> to vector<1xf32>
    %237 = vector.shape_cast %236 : vector<1xf32> to vector<1x1xf32>
    %238 = vector.broadcast %237 : vector<1x1xf32> to vector<1x8xf32>
    %239 = arith.subf %235, %238 : vector<1x8xf32>
    %240 = math.exp %239 : vector<1x8xf32>
    %cst_85 = arith.constant dense<0.000000e+00> : vector<1xf32>
    %241 = vector.multi_reduction <add>, %240, %cst_85 [1] : vector<1x8xf32> to vector<1xf32>
    %242 = vector.shape_cast %241 : vector<1xf32> to vector<1x1xf32>
    %243 = tpu.reciprocal %242 {approx = true} : vector<1x1xf32> -> vector<1x1xf32>
    %244 = vector.broadcast %243 : vector<1x1xf32> to vector<1x8xf32>
    %245 = arith.mulf %240, %244 : vector<1x8xf32>
    %246 = arith.truncf %245 : vector<1x8xf32> to vector<1x8xbf16>
    %247 = arith.truncf %232 : vector<8x16xf32> to vector<8x16xbf16>
    %cst_86 = arith.constant dense<0.000000e+00> : vector<1x16xf32>
    %248 = tpu.matmul %246, %247, %cst_86 {dimension_numbers = #tpu.dot_dimension_numbers<[1], [0], [0], [1], [0, 0, 1, 1], [], []>} : vector<1x8xbf16>, vector<8x16xbf16>, vector<1x16xf32> -> vector<1x16xf32>
    %249 = vector.extract_strided_slice %209 {offsets = [0, 32], sizes = [1, 16], strides = [1, 1]} : vector<1x64xf32> to vector<1x16xf32>
    %250 = vector.extract_strided_slice %208 {offsets = [0, 16], sizes = [8, 16], strides = [1, 1]} : vector<8x32xf32> to vector<8x16xf32>
    %251 = vector.extract_strided_slice %198 {offsets = [0, 16], sizes = [8, 16], strides = [1, 1]} : vector<8x32xf32> to vector<8x16xf32>
    %252 = arith.truncf %249 : vector<1x16xf32> to vector<1x16xbf16>
    %253 = arith.truncf %250 : vector<8x16xf32> to vector<8x16xbf16>
    %cst_87 = arith.constant dense<0.000000e+00> : vector<1x8xf32>
    %254 = tpu.matmul %252, %253, %cst_87 {dimension_numbers = #tpu.dot_dimension_numbers<[1], [1], [0], [0], [0, 0, 1, 0], [], []>} : vector<1x16xbf16>, vector<8x16xbf16>, vector<1x8xf32> -> vector<1x8xf32>
    %cst_88 = arith.constant dense<0xFF800000> : vector<1xf32>
    %255 = vector.multi_reduction <maximumf>, %254, %cst_88 [1] : vector<1x8xf32> to vector<1xf32>
    %256 = vector.shape_cast %255 : vector<1xf32> to vector<1x1xf32>
    %257 = vector.broadcast %256 : vector<1x1xf32> to vector<1x8xf32>
    %258 = arith.subf %254, %257 : vector<1x8xf32>
    %259 = math.exp %258 : vector<1x8xf32>
    %cst_89 = arith.constant dense<0.000000e+00> : vector<1xf32>
    %260 = vector.multi_reduction <add>, %259, %cst_89 [1] : vector<1x8xf32> to vector<1xf32>
    %261 = vector.shape_cast %260 : vector<1xf32> to vector<1x1xf32>
    %262 = tpu.reciprocal %261 {approx = true} : vector<1x1xf32> -> vector<1x1xf32>
    %263 = vector.broadcast %262 : vector<1x1xf32> to vector<1x8xf32>
    %264 = arith.mulf %259, %263 : vector<1x8xf32>
    %265 = arith.truncf %264 : vector<1x8xf32> to vector<1x8xbf16>
    %266 = arith.truncf %251 : vector<8x16xf32> to vector<8x16xbf16>
    %cst_90 = arith.constant dense<0.000000e+00> : vector<1x16xf32>
    %267 = tpu.matmul %265, %266, %cst_90 {dimension_numbers = #tpu.dot_dimension_numbers<[1], [0], [0], [1], [0, 0, 1, 1], [], []>} : vector<1x8xbf16>, vector<8x16xbf16>, vector<1x16xf32> -> vector<1x16xf32>
    %268 = vector.extract_strided_slice %209 {offsets = [0, 48], sizes = [1, 16], strides = [1, 1]} : vector<1x64xf32> to vector<1x16xf32>
    %269 = vector.extract_strided_slice %208 {offsets = [0, 16], sizes = [8, 16], strides = [1, 1]} : vector<8x32xf32> to vector<8x16xf32>
    %270 = vector.extract_strided_slice %198 {offsets = [0, 16], sizes = [8, 16], strides = [1, 1]} : vector<8x32xf32> to vector<8x16xf32>
    %271 = arith.truncf %268 : vector<1x16xf32> to vector<1x16xbf16>
    %272 = arith.truncf %269 : vector<8x16xf32> to vector<8x16xbf16>
    %cst_91 = arith.constant dense<0.000000e+00> : vector<1x8xf32>
    %273 = tpu.matmul %271, %272, %cst_91 {dimension_numbers = #tpu.dot_dimension_numbers<[1], [1], [0], [0], [0, 0, 1, 0], [], []>} : vector<1x16xbf16>, vector<8x16xbf16>, vector<1x8xf32> -> vector<1x8xf32>
    %cst_92 = arith.constant dense<0xFF800000> : vector<1xf32>
    %274 = vector.multi_reduction <maximumf>, %273, %cst_92 [1] : vector<1x8xf32> to vector<1xf32>
    %275 = vector.shape_cast %274 : vector<1xf32> to vector<1x1xf32>
    %276 = vector.broadcast %275 : vector<1x1xf32> to vector<1x8xf32>
    %277 = arith.subf %273, %276 : vector<1x8xf32>
    %278 = math.exp %277 : vector<1x8xf32>
    %cst_93 = arith.constant dense<0.000000e+00> : vector<1xf32>
    %279 = vector.multi_reduction <add>, %278, %cst_93 [1] : vector<1x8xf32> to vector<1xf32>
    %280 = vector.shape_cast %279 : vector<1xf32> to vector<1x1xf32>
    %281 = tpu.reciprocal %280 {approx = true} : vector<1x1xf32> -> vector<1x1xf32>
    %282 = vector.broadcast %281 : vector<1x1xf32> to vector<1x8xf32>
    %283 = arith.mulf %278, %282 : vector<1x8xf32>
    %284 = arith.truncf %283 : vector<1x8xf32> to vector<1x8xbf16>
    %285 = arith.truncf %270 : vector<8x16xf32> to vector<8x16xbf16>
    %cst_94 = arith.constant dense<0.000000e+00> : vector<1x16xf32>
    %286 = tpu.matmul %284, %285, %cst_94 {dimension_numbers = #tpu.dot_dimension_numbers<[1], [0], [0], [1], [0, 0, 1, 1], [], []>} : vector<1x8xbf16>, vector<8x16xbf16>, vector<1x16xf32> -> vector<1x16xf32>
    %287 = tpu.concatenate %229, %248, %267, %286 in 1 : vector<1x16xf32>, vector<1x16xf32>, vector<1x16xf32>, vector<1x16xf32> -> vector<1x64xf32>
    %c1_95 = arith.constant 1 : index
    %c0_96 = arith.constant 0 : index
    %c0_97 = arith.constant 0 : index
    %288 = vector.load %arg10[%c1_95, %c0_96, %c0_97] : memref<2x64x64xbf16, #tpu.memory_space<vmem>>, vector<1x64x64xbf16>
    %289 = vector.shape_cast %288 : vector<1x64x64xbf16> to vector<64x64xbf16>
    %290 = arith.truncf %287 : vector<1x64xf32> to vector<1x64xbf16>
    %cst_98 = arith.constant dense<0.000000e+00> : vector<1x64xf32>
    %291 = tpu.matmul %290, %289, %cst_98 {dimension_numbers = #tpu.dot_dimension_numbers<[1], [0], [0], [1], [0, 0, 1, 1], [], []>} : vector<1x64xbf16>, vector<64x64xbf16>, vector<1x64xf32> -> vector<1x64xf32>
    %292 = arith.addf %210, %291 : vector<1x64xf32>
    %c1_99 = arith.constant 1 : index
    %c0_100 = arith.constant 0 : index
    %c0_101 = arith.constant 0 : index
    %293 = vector.load %arg11[%c1_99, %c0_100, %c0_101] : memref<2x1x64xf32, #tpu.memory_space<vmem>>, vector<1x1x64xf32>
    %294 = vector.shape_cast %293 : vector<1x1x64xf32> to vector<1x64xf32>
    %295 = arith.mulf %292, %292 : vector<1x64xf32>
    %cst_102 = arith.constant dense<0.000000e+00> : vector<1xf32>
    %296 = vector.multi_reduction <add>, %295, %cst_102 [1] : vector<1x64xf32> to vector<1xf32>
    %297 = vector.shape_cast %296 : vector<1xf32> to vector<1x1xf32>
    %cst_103 = arith.constant 6.400000e+01 : f32
    %298 = vector.broadcast %cst_103 : f32 to vector<1x1xf32>
    %299 = arith.divf %297, %298 : vector<1x1xf32>
    %cst_104 = arith.constant 9.99999997E-7 : f32
    %300 = vector.broadcast %cst_104 : f32 to vector<1x1xf32>
    %301 = arith.addf %299, %300 : vector<1x1xf32>
    %302 = math.rsqrt %301 : vector<1x1xf32>
    %303 = vector.broadcast %302 : vector<1x1xf32> to vector<1x64xf32>
    %304 = arith.mulf %292, %303 : vector<1x64xf32>
    %305 = arith.mulf %304, %294 : vector<1x64xf32>
    %c1_105 = arith.constant 1 : index
    %c0_106 = arith.constant 0 : index
    %c0_107 = arith.constant 0 : index
    %306 = vector.load %arg12[%c1_105, %c0_106, %c0_107] : memref<2x64x256xbf16, #tpu.memory_space<vmem>>, vector<1x64x256xbf16>
    %307 = vector.shape_cast %306 : vector<1x64x256xbf16> to vector<64x256xbf16>
    %308 = arith.truncf %305 : vector<1x64xf32> to vector<1x64xbf16>
    %cst_108 = arith.constant dense<0.000000e+00> : vector<1x256xf32>
    %309 = tpu.matmul %308, %307, %cst_108 {dimension_numbers = #tpu.dot_dimension_numbers<[1], [0], [0], [1], [0, 0, 1, 1], [], []>} : vector<1x64xbf16>, vector<64x256xbf16>, vector<1x256xf32> -> vector<1x256xf32>
    %310 = vector.extract_strided_slice %309 {offsets = [0, 0], sizes = [1, 128], strides = [1, 1]} : vector<1x256xf32> to vector<1x128xf32>
    %311 = vector.extract_strided_slice %309 {offsets = [0, 128], sizes = [1, 128], strides = [1, 1]} : vector<1x256xf32> to vector<1x128xf32>
    %312 = arith.negf %310 : vector<1x128xf32>
    %313 = math.exp %312 : vector<1x128xf32>
    %cst_109 = arith.constant 1.000000e+00 : f32
    %314 = vector.broadcast %cst_109 : f32 to vector<1x128xf32>
    %315 = arith.addf %314, %313 : vector<1x128xf32>
    %316 = arith.divf %314, %315 : vector<1x128xf32>
    %317 = arith.mulf %310, %316 : vector<1x128xf32>
    %318 = arith.mulf %317, %311 : vector<1x128xf32>
    %c1_110 = arith.constant 1 : index
    %c0_111 = arith.constant 0 : index
    %c0_112 = arith.constant 0 : index
    %319 = vector.load %arg13[%c1_110, %c0_111, %c0_112] : memref<2x128x64xbf16, #tpu.memory_space<vmem>>, vector<1x128x64xbf16>
    %320 = vector.shape_cast %319 : vector<1x128x64xbf16> to vector<128x64xbf16>
    %321 = arith.truncf %318 : vector<1x128xf32> to vector<1x128xbf16>
    %cst_113 = arith.constant dense<0.000000e+00> : vector<1x64xf32>
    %322 = tpu.matmul %321, %320, %cst_113 {dimension_numbers = #tpu.dot_dimension_numbers<[1], [0], [0], [1], [0, 0, 1, 1], [], []>} : vector<1x128xbf16>, vector<128x64xbf16>, vector<1x64xf32> -> vector<1x64xf32>
    %323 = arith.addf %292, %322 : vector<1x64xf32>
    %324 = tpu.concatenate %55, %45, %208, %198 in 1 : vector<8x32xf32>, vector<8x32xf32>, vector<8x32xf32>, vector<8x32xf32> -> vector<8x128xf32>
    %c0_114 = arith.constant 0 : index
    %c0_115 = arith.constant 0 : index
    %325 = vector.load %arg17[%c0_114, %c0_115] : memref<8x128xf32, #tpu.memory_space<vmem>>, vector<8x128xf32>
    tpu.vector_store %arg17[%c0_114, %c0_115], %324 {strides = array<i32>} : memref<8x128xf32, #tpu.memory_space<vmem>>, vector<8x128xf32>,
    %c0_116 = arith.constant 0 : index
    %c0_117 = arith.constant 0 : index
    %326 = vector.load %arg14[%c0_116, %c0_117] : memref<1x64xf32, #tpu.memory_space<vmem>>, vector<1x64xf32>
    %327 = arith.mulf %323, %323 : vector<1x64xf32>
    %cst_118 = arith.constant dense<0.000000e+00> : vector<1xf32>
    %328 = vector.multi_reduction <add>, %327, %cst_118 [1] : vector<1x64xf32> to vector<1xf32>
    %329 = vector.shape_cast %328 : vector<1xf32> to vector<1x1xf32>
    %cst_119 = arith.constant 6.400000e+01 : f32
    %330 = vector.broadcast %cst_119 : f32 to vector<1x1xf32>
    %331 = arith.divf %329, %330 : vector<1x1xf32>
    %cst_120 = arith.constant 9.99999997E-7 : f32
    %332 = vector.broadcast %cst_120 : f32 to vector<1x1xf32>
    %333 = arith.addf %331, %332 : vector<1x1xf32>
    %334 = math.rsqrt %333 : vector<1x1xf32>
    %335 = vector.broadcast %334 : vector<1x1xf32> to vector<1x64xf32>
    %336 = arith.mulf %323, %335 : vector<1x64xf32>
    %337 = arith.mulf %336, %326 : vector<1x64xf32>
    %c0_121 = arith.constant 0 : index
    %c0_122 = arith.constant 0 : index
    %338 = vector.load %arg15[%c0_121, %c0_122] : memref<64x32xbf16, #tpu.memory_space<vmem>>, vector<64x32xbf16>
    %339 = arith.truncf %337 : vector<1x64xf32> to vector<1x64xbf16>
    %cst_123 = arith.constant dense<0.000000e+00> : vector<1x32xf32>
    %340 = tpu.matmul %339, %338, %cst_123 {dimension_numbers = #tpu.dot_dimension_numbers<[1], [0], [0], [1], [0, 0, 1, 1], [], []>} : vector<1x64xbf16>, vector<64x32xbf16>, vector<1x32xf32> -> vector<1x32xf32>
    %c0_124 = arith.constant 0 : index
    %c0_125 = arith.constant 0 : index
    %341 = vector.load %arg16[%c0_124, %c0_125] : memref<1x32xf32, #tpu.memory_space<vmem>>, vector<1x32xf32>
    tpu.vector_store %arg16[%c0_124, %c0_125], %340 {strides = array<i32>} : memref<1x32xf32, #tpu.memory_space<vmem>>, vector<1x32xf32>,
    return
  }
}

</mosaic_0001>

<bundles_post_ra>
// kernel: tile.15
= control target key start
LH: loop header
LB: loop body
LE: loop exit
PB: predicated region body
PF: predicated region fallthrough
CT: control target
= control target key end

     0   :  { %vm36_vm0 = vcmask 1047556   ;;  %s81_s22 = smov 16   ;;  %s82_s23 = smov 32   ;;  %vm38_vm1 = vcmask 130048   ;;  %vm48_vm2 = vcmask 523648   ;;  %vm58_vm3 = vcmask 392448   ;;  %s133_s0 = inlined_call_operand.vmem [shape: f32[8,4,16], index: 0, kind: input, shape index: {}]   ;;  %s134_s1 = inlined_call_operand.vmem [shape: f32[8,64], index: 1, kind: output, shape index: {}]  }
   0x1   :  { %v70_v0 = vld [vmem:[%s133_s0 + $0x1c] sm:$0xf]  ;;  %v71_v1 = vld [vmem:[%s133_s0 + $0x18] sm:$0xf]  ;;  %v72_v2 = vld [vmem:[%s133_s0 + $0x14] sm:$0xf] }
   0x2   :  { %7 = vst [vmem:[#allocation0 + $0x38] sm:$0xf] %v70_v0  ;;  %v73_v3 = vld [vmem:[%s133_s0 + $0x10] sm:$0xf]  ;;  %v74_v4 = vld [vmem:[%s133_s0 + $0xc] sm:$0xf] }
   0x3   :  { %11 = vst [vmem:[#allocation0 + $0x30] sm:$0xf] %v71_v1  ;;  %v75_v5 = vld [vmem:[%s133_s0 + $0x8] sm:$0xf]  ;;  %v76_v6 = vld [vmem:[%s133_s0 + $0x4] sm:$0xf] }
   0x4   :  { %15 = vst [vmem:[#allocation0 + $0x28] sm:$0xf] %v72_v2  ;;  %v32_v7 = vld [vmem:[%s133_s0] sm:$0xf]  ;;  %s80_s0 = smov 48   ;;  %vm68_vm4 = vcmask 261248  }
   0x5   :  { %19 = vst [vmem:[#allocation0 + $0x20] sm:$0xf] %v73_v3 }
   0x6   :  { %23 = vst [vmem:[#allocation0 + $0x18] sm:$0xf] %v74_v4 }
   0x7   :  { %27 = vst [vmem:[#allocation0 + $0x10] sm:$0xf] %v75_v5 }
   0x8   :  { %31 = vst [vmem:[#allocation0 + $0x8] sm:$0xf] %v76_v6 }
   0x9   :  { %33 = vst [vmem:[#allocation0] sm:$0xf] %v32_v7 }
   0xc   :  { %v43_v8 = vld [vmem:[#allocation0 + $0x3] ss:$8 sm:$0xf0]   ;;  %v63_v9 = vld [vmem:[#allocation0 + $0x1] ss:$8 sm:$0xf0]  }
   0xd   :  { %v53_v15 = vld [vmem:[#allocation0 + $0x2] ss:$8 sm:$0xf0]   ;;  %v35_v18 = vld [vmem:[#allocation0] ss:$8 sm:$0xf0]  }
  0x10   :  { %v41_v10 = vld [vmem:[#allocation0 + $0x3] ss:$8 sm:$0xf]   ;;  %v61_v12 = vld [vmem:[#allocation0 + $0x1] ss:$8 sm:$0xf]  }
  0x11   :  { %v45_v11 = vsel %vm36_vm0, %v43_v8, %v41_v10  ;;  %v65_v13 = vsel %vm36_vm0, %v63_v9, %v61_v12  ;;  %v51_v14 = vld [vmem:[#allocation0 + $0x2] ss:$8 sm:$0xf]   ;;  %v34_v17 = vld [vmem:[#allocation0] ss:$8 sm:$0xf]  }
  0x12   :  { %46 = vrot.lane.b32.xlu0 %v45_v11, %s80_s0  ;;  %66 = vrot.lane.b32.xlu1 %v65_v13, %s81_s22  ;;  %v55_v16 = vsel %vm36_vm0, %v53_v15, %v51_v14  ;;  %v37_v19 = vsel %vm36_vm0, %v35_v18, %v34_v17 }
  0x13   :  { %39 = vst.msk [vmem:[%s134_s1] sm:$0xff] %vm38_vm1, %v37_v19  }
  0x1a   :  { %56 = vrot.lane.b32.xlu0 %v55_v16, %s82_s23 }
  0x84   :  { %v47_v20 = vpop.permute.xlu0 %46   ;;  %v67_v21 = vpop.permute.xlu1 %66  }
  0x85   :  { %49 = vst.msk [vmem:[%s134_s1] sm:$0xff] %vm48_vm2, %v47_v20  }
  0x8c   :  { %v57_v22 = vpop.permute.xlu0 %56  }
  0x8d   :  { %59 = vst.msk [vmem:[%s134_s1] sm:$0xff] %vm58_vm3, %v57_v22  }
  0x8e   :  { %69 = vst.msk [vmem:[%s134_s1] sm:$0xff] %vm68_vm4, %v67_v21  }

// kernel: talker_forward.1
= control target key start
LH: loop header
LB: loop body
LE: loop exit
PB: predicated region body
PF: predicated region fallthrough
CT: control target
= control target key end

     0   :  { %s2538_s0 = inlined_call_operand.vmem [shape: f32[8,48], index: 0, kind: input, shape index: {}]   ;;  %s2539_s1 = inlined_call_operand.vmem [shape: f32[8,64], index: 1, kind: input, shape index: {}]   ;;  %s2540_s2 = inlined_call_operand.vmem [shape: f32[8,64], index: 2, kind: input, shape index: {}]   ;;  %s2541_s3 = inlined_call_operand.vmem [shape: bf16[64,64], index: 3, kind: input, shape index: {}]   ;;  %s2542_s4 = inlined_call_operand.vmem [shape: bf16[32,32], index: 4, kind: input, shape index: {}]   ;;  %s2543_s5 = inlined_call_operand.vmem [shape: bf16[48,64], index: 5, kind: input, shape index: {}]   ;;  %s2544_s6 = inlined_call_operand.vmem [shape: f32[1,64], index: 6, kind: input, shape index: {}]   ;;  %s2545_s7 = inlined_call_operand.vmem [shape: f32[2,1,64], index: 7, kind: input, shape index: {}]   ;;  %s2546_s8 = inlined_call_operand.vmem [shape: bf16[2,64,128], index: 8, kind: input, shape index: {}]   ;;  %s2547_s9 = inlined_call_operand.vmem [shape: f32[2,1,128], index: 9, kind: input, shape index: {}]   ;;  %s2548_s10 = inlined_call_operand.vmem [shape: bf16[2,64,64], index: 10, kind: input, shape index: {}]   ;;  %s2549_s11 = inlined_call_operand.vmem [shape: f32[2,1,64], index: 11, kind: input, shape index: {}]   ;;  %s2550_s12 = inlined_call_operand.vmem [shape: bf16[2,64,256], index: 12, kind: input, shape index: {}]   ;;  %s2551_s13 = inlined_call_operand.vmem [shape: bf16[2,128,64], index: 13, kind: input, shape index: {}]   ;;  %s2552_s14 = inlined_call_operand.vmem [shape: f32[1,64], index: 14, kind: input, shape index: {}]   ;;  %s2553_s15 = inlined_call_operand.vmem [shape: bf16[64,32], index: 15, kind: input, shape index: {}]   ;;  %s2554_s16 = inlined_call_operand.hbm [shape: f32[1,32], index: 16, kind: output, shape index: {0}]   ;;  %s2555_s17 = inlined_call_operand.vmem [shape: f32[8,128], index: 17, kind: output, shape index: {1}]  }
   0x1   :  { %2556 = sst [smem:[#allocation5_spill]] %s2538_s0 }
   0x2   :  { %2557 = sst [smem:[#allocation6_spill]] %s2539_s1 }
   0x3   :  { %v1813_v0 = vld [vmem:[%s2543_s5 + $0x10] sm:$0xff]  ;;  %v1812_v1 = vld [vmem:[%s2543_s5 + $0x8] sm:$0xff] }
   0x4   :  { %96 = vmatpush.bf16.msra.mxu0 %v1813_v0 }
   0x5   :  { %23 = vsyncpa [#allocation3], 0  ;;  %v1811_v2 = vld [vmem:[%s2543_s5] sm:$0xff]  ;;  %s2558_s18 = sld [smem:[#allocation5_spill]]  ;;  %vm87_vm0 = vcmask 392192   ;;  %vm126_vm1 = vcmask 523264  }
   0x6   :  { %v1882_v5 = vld [vmem:[%s2544_s6] ss:$0 sm:$0xff]  ;;  %v1968_v11 = vmov 64.0   ;;  %v1823_v13 = vld [vmem:[%s2546_s8 + $0x18] sm:$0xff]  ;;  %v1822_v15 = vld [vmem:[%s2546_s8 + $0x10] sm:$0xff]  ;;  %s2559_s28 = sld [smem:[#allocation6_spill]] }
   0x7   :  { %1890 = vrcp.f32 %v1968_v11  ;;  %198 = vmatpush.bf16.msra.mxu1 %v1823_v13  ;;  %v1821_v17 = vld [vmem:[%s2546_s8 + $0x8] sm:$0xff]  ;;  %v1820_v19 = vld [vmem:[%s2546_s8] sm:$0xff]  ;;  %v2109_v22 = vld [vmem:[%s2541_s3 + $0x18] sm:$0xff]  ;;  %s1969_s30 = smov 64   ;;  %vm271_vm6 = vcmask 261120   ;;  %s1971_s29 = smov 80  }
   0x8   :  { %97 = vmatpush.bf16.msra.mxu0 %v1812_v1  ;;  %v2119_v24 = vld [vmem:[%s2541_s3 + $0x10] sm:$0xff]  ;;  %v2126_v28 = vld [vmem:[%s2541_s3 + $0x8] sm:$0xff]  ;;  %v1883_v35 = vld [vmem:[%s2545_s7] ss:$0 sm:$0xff]  ;;  %s1972_s0 = smov 112   ;;  %vm299_vm7 = vcmask 130048  }
   0x9   :  { %v2137_v40 = vld [vmem:[%s2541_s3] sm:$0xff]  ;;  %v2143_v41 = vld [vmem:[%s2542_s4 + $0x8] sm:$0xff]  ;;  %v1974_v11 = vmov -3.4028235e+38   ;;  %vm319_vm9 = vcmask 64512   ;;  %s1975_s19 = smov 32  }
   0xa   :  { %281 = vmatpush.bf16.msra.mxu3 %v2143_v41  ;;  %v2149_v42 = vld [vmem:[%s2542_s4] sm:$0xff]  ;;  %vm337_vm10 = vcmask 1043456   ;;  %s1976_s1 = smov 16   ;;  %s1479_s4 = sshll.u32 %s2554_s16, 4  ;;  %s1480_s4 = int_to_ptr.hbm [resolvable:$true] %s1479_s4 }
   0xb   :  { %v57_v3 = vld [vmem:[%s2558_s18] sm:$0xff]  ;;  %199 = vmatpush.bf16.msra.mxu1 %v1822_v15  ;;  %s1973_s18 = smov 96  }
   0xc   :  { %v64_v4 = vpack.c.bf16 %v57_v3, %v57_v3  ;;  %98 = vmatpush.bf16.msra.mxu0 %v1811_v2  ;;  %v2104_v21 = vld [vmem:[%s2559_s28] sm:$0xff] }
   0xd   :  { %v1891_v12 = vpop.eup %1890  ;;  %252 = vrot.lane.b32.xlu1 %v2104_v21, %s1969_s30  ;;  %v1884_v43 = vld [vmem:[%s2547_s9] ss:$0 sm:$0xff] }
   0xe   :  { %v131_v14 = vmul.f32 64.0, %v1891_v12  ;;  %vm135_vm2 = vweird.f32 %v1891_v12  ;;  %282 = vmatpush.bf16.msra.mxu3 %v2149_v42  ;;  %v2169_v51 = vld [vmem:[%s2540_s2] sm:$0xff]  ;;  %s1970_s2 = smov 48  }
   0xf   :  { %1504 = vmatmul.msk.bf16.vlgmr.msra.gmra.mxu0 %vm87_vm0, %v64_v4  ;;  %200 = vmatpush.bf16.msra.mxu1 %v1821_v17 }
  0x10   :  { %v132_v16 = vsub.f32 1.0, %v131_v14  ;;  %240 = vmatpush.bf16.msrb.mxu0 %v2109_v22 }
  0x12   :  { %v133_v18 = vmul.f32 %v1891_v12, %v132_v16 }
  0x13   :  { %201 = vmatpush.bf16.msra.mxu1 %v1820_v19 }
  0x14   :  { %v134_v20 = vadd.f32 %v1891_v12, %v133_v18  ;;  %241 = vmatpush.bf16.msrb.mxu0 %v2119_v24 }
  0x16   :  { %v2111_v23 = vsel %vm135_vm2, %v1891_v12, %v134_v20 }
  0x18   :  { %242 = vmatpush.bf16.msrb.mxu0 %v2126_v28 }
  0x1c   :  { %243 = vmatpush.bf16.msrb.mxu0 %v2137_v40 }
  0x7f   :  { %v2173_v55 = vpop.permute.xlu1 %252 }
  0x8c   :  { %v100_v6 = vpop.f32.mrf.mxu0 }
  0x8d   :  { %v2084_v7 = vadd.f32 %v1882_v5, %v100_v6 }
  0x8f   :  { %v125_v8 = vmul.f32 %v2084_v7, %v2084_v7 }
  0x91   :  { %v127_v9 = vsel %vm126_vm1, %v125_v8, 0.0  ;;  %v118_v8 = vlaneseq }
  0x92   :  { %128 = vadd.xlane.f32.xlu0 %v127_v9 }
  0x93   :  { %v119_v9 = vshrl.u32 %v118_v8, 7 }
  0x94   :  { %v102_v10 = vpop.f32.mrf.mxu0 }
  0x95   :  { %v121_v10 = vand.u32 127, %v118_v8 }
  0x97   :  { %vm122_vm8 = vcmp.le.s32.totalorder %v121_v10, %v119_v9 }
  0x98   :  { %v123_v12 = vsel %vm122_vm8, 0.0, %v1974_v11 }
 0x105   :  { %v129_v25 = vpop.xlane.xlu0 %128 }
 0x106   :  { %v137_v26 = vmul.f32 %v2111_v23, %v129_v25 }
 0x108   :  { %v138_v27 = vadd.f32 1e-06, %v137_v26 }
 0x10a   :  { %1892 = vrsqrt.f32 %v138_v27  ;;  %vm145_vm4 = vweird.f32 %v138_v27 }
 0x110   :  { %v1893_v29 = vpop.eup %1892 }
 0x111   :  { %v140_v30 = vmul.f32 %v1893_v29, %v138_v27  ;;  %vm146_vm3 = vweird.f32 %v1893_v29 }
 0x112   :  { %vm147_vm5 = vmor %vm145_vm4, %vm146_vm3 }
 0x113   :  { %v141_v31 = vmul.f32 %v1893_v29, %v140_v30 }
 0x115   :  { %v142_v32 = vmul.f32 0.5, %v141_v31 }
 0x117   :  { %v143_v33 = vsub.f32 1.5, %v142_v32 }
 0x119   :  { %v144_v34 = vmul.f32 %v1893_v29, %v143_v33 }
 0x11b   :  { %v148_v36 = vsel %vm147_vm5, %v1893_v29, %v144_v34 }
 0x11c   :  { %v149_v37 = vmul.f32 %v148_v36, %v2084_v7 }
 0x11e   :  { %v153_v38 = vmul.f32 %v1883_v35, %v149_v37 }
 0x120   :  { %v162_v39 = vpack.c.bf16 %v153_v38, %v153_v38 }
 0x122   :  { %1521 = vmatmul.msk.bf16.vlgmr.msra.gmra.mxu1 %vm126_vm1, %v162_v39 }
 0x19f   :  { %v203_v44 = vpop.f32.mrf.mxu1 }
 0x1a0   :  { %v2155_v45 = vadd.f32 %v1884_v43, %v203_v44 }
 0x1a2   :  { %v2159_v46 = vpack.c.bf16 %v2155_v45, %v2155_v45  ;;  %v255_v56 = vmul.f32 %v2173_v55, %v2155_v45  ;;  %v207_v61 = vmul.f32 %v2155_v45, %v2104_v21 }
 0x1a4   :  { %257 = vrot.lane.b32.xlu0 %v2159_v46, %s1969_s30  ;;  %1538 = vmatmul.msk.bf16.vlgmr.msrb.gmra.mxu0 %vm126_vm1, %v2159_v46 }
 0x1a7   :  { %v205_v47 = vpop.f32.mrf.mxu1 }
 0x216   :  { %v258_v48 = vpop.permute.xlu0 %257 }
 0x217   :  { %1547 = vmatmul.msk.bf16.vlgmr.msra.gmra.mxu3 %vm271_vm6, %v258_v48 }
 0x221   :  { %v245_v49 = vpop.f32.mrf.mxu0 }
 0x222   :  { %v249_v59 = vmul.f32 %v245_v49, %v2169_v51 }
 0x224   :  { %v250_v62 = vadd.f32 %v249_v59, %v207_v61 }
 0x226   :  { %v294_v63 = vpack.c.bf16 %v250_v62, %v250_v62 }
 0x229   :  { %v247_v50 = vpop.f32.mrf.mxu0 }
 0x29a   :  { %v284_v52 = vpop.f32.mrf.mxu3 }
 0x29b   :  { %v288_v53 = vmul.f32 %v284_v52, %v2169_v51 }
 0x29d   :  { %290 = vrot.lane.b32.xlu1 %v288_v53, %s1969_s30 }
 0x2a2   :  { %v286_v54 = vpop.f32.mrf.mxu3 }
 0x30f   :  { %v291_v57 = vpop.permute.xlu1 %290 }
 0x310   :  { %v2177_v58 = vadd.f32 %v291_v57, %v255_v56 }
 0x312   :  { %v295_v60 = vpack.c.bf16 %v2177_v58, %v2177_v58 }
 0x314   :  { %403 = vrot.lane.b32.xlu1 %v295_v60, %s1970_s2  ;;  %297 = vrot.lane.b32.xlu2 %v295_v60, %s1969_s30 }
 0x31c   :  { %457 = vrot.lane.b32.xlu1 %v294_v63, %s1971_s29  ;;  %355 = vrot.lane.b32.xlu2 %v294_v63, %s1972_s0 }
 0x324   :  { %401 = vrot.lane.b32.xlu2 %v294_v63, %s1973_s18 }
 0x36e   :  { %v298_v0 = vpop.permute.xlu2 %297 }
 0x36f   :  { %v304_v1 = vsel %vm299_vm7, %v298_v0, 0 }
 0x370   :  { %313 = vmatpush.bf16.xpose.msrb.mxu3 %v304_v1  ;;  %367 = vmatpush.bf16.xpose.msrb.mxu1 %v304_v1 }
 0x376   :  { %v356_v2 = vpop.permute.xlu2 %355 }
 0x377   :  { %1548 = vmatmul.msk.bf16.vlgmr.msrb.gmra.mxu3 %vm299_vm7, %v294_v63  ;;  %1550 = vmatmul.msk.bf16.vlgmr.msrb.gmra.mxu1 %vm299_vm7, %v356_v2 }
 0x37e   :  { %v402_v5 = vpop.permute.xlu2 %401 }
 0x386   :  { %v404_v3 = vpop.permute.xlu1 %403 }
 0x387   :  { %v409_v4 = vsel %vm299_vm7, %v404_v3, 0 }
 0x388   :  { %418 = vmatpush.bf16.xpose.msra.mxu3 %v409_v4  ;;  %469 = vmatpush.bf16.xpose.msra.mxu1 %v409_v4 }
 0x38e   :  { %v458_v6 = vpop.permute.xlu1 %457 }
 0x38f   :  { %1552 = vmatmul.msk.bf16.vlgmr.msra.gmra.mxu3 %vm299_vm7, %v402_v5  ;;  %1554 = vmatmul.msk.bf16.vlgmr.msra.gmra.mxu1 %vm299_vm7, %v458_v6 }
 0x3f4   :  { %v369_v13 = vpop.f32.mrf.mxu1 }
 0x3f5   :  { %v370_v14 = vadd.f32 %v369_v13, %v123_v12 }
 0x3f7   :  { %v373_v15 = vsel %vm319_vm9, %v370_v14, -inf }
 0x3f8   :  { %374 = vmax.xlane.f32.xlu0 %v373_v15 }
 0x3fa   :  { %v315_v16 = vpop.f32.mrf.mxu3 }
 0x3fb   :  { %v316_v17 = vadd.f32 %v315_v16, %v123_v12 }
 0x3fc   :  { %v371_v18 = vpop.f32.mrf.mxu1 }
 0x3fd   :  { %v320_v19 = vsel %vm319_vm9, %v316_v17, -inf }
 0x3fe   :  { %321 = vmax.xlane.f32.xlu2 %v320_v19 }
 0x402   :  { %v317_v20 = vpop.f32.mrf.mxu3 }
 0x40c   :  { %v471_v25 = vpop.f32.mrf.mxu1 }
 0x40d   :  { %v472_v26 = vadd.f32 %v471_v25, %v123_v12 }
 0x40f   :  { %v475_v27 = vsel %vm319_vm9, %v472_v26, -inf }
 0x410   :  { %476 = vmax.xlane.f32.xlu1 %v475_v27 }
 0x412   :  { %v420_v29 = vpop.f32.mrf.mxu3 }
 0x413   :  { %v421_v30 = vadd.f32 %v420_v29, %v123_v12 }
 0x414   :  { %v473_v31 = vpop.f32.mrf.mxu1 }
 0x415   :  { %v424_v32 = vsel %vm319_vm9, %v421_v30, -inf  ;;  %v1827_v31 = vld [vmem:[%s2548_s10 + $0x18] sm:$0xff] }
 0x416   :  { %425 = vmax.xlane.f32.xlu2 %v424_v32  ;;  %558 = vmatpush.bf16.msrb.mxu3 %v1827_v31  ;;  %v1826_v32 = vld [vmem:[%s2548_s10 + $0x10] sm:$0xff]  ;;  %v1839_v31 = vld [vmem:[%s2551_s13 + $0x18] sm:$0xff] }
 0x41a   :  { %v422_v33 = vpop.f32.mrf.mxu3  ;;  %559 = vmatpush.bf16.msrb.mxu3 %v1826_v32  ;;  %v1838_v32 = vld [vmem:[%s2551_s13 + $0x10] sm:$0xff] }
 0x41b   :  { %v1825_v33 = vld [vmem:[%s2548_s10 + $0x8] sm:$0xff] }
 0x41e   :  { %560 = vmatpush.bf16.msrb.mxu3 %v1825_v33  ;;  %v1837_v33 = vld [vmem:[%s2551_s13 + $0x8] sm:$0xff] }
 0x42e   :  { %332 = vrot.lane.b32.xlu2 %v2159_v46, %s1975_s19 }
 0x46b   :  { %v375_v34 = vpop.xlane.xlu0 %374 }
 0x46c   :  { %v376_v35 = vsub.f32 %v370_v14, %v375_v34  ;;  %v1824_v34 = vld [vmem:[%s2548_s10] sm:$0xff] }
 0x46d   :  { %561 = vmatpush.bf16.msrb.mxu3 %v1824_v34  ;;  %v1836_v34 = vld [vmem:[%s2551_s13] sm:$0xff] }
 0x46e   :  { %v377_v36 = vmul.f32 1.442695, %v376_v35 }
 0x470   :  { %1894 = vpow2.f32 %v377_v36 }
 0x471   :  { %v322_v37 = vpop.xlane.xlu2 %321 }
 0x472   :  { %v323_v38 = vsub.f32 %v316_v17, %v322_v37 }
 0x474   :  { %v324_v39 = vmul.f32 1.442695, %v323_v38 }
 0x476   :  { %v1895_v43 = vpop.eup %1894  ;;  %1896 = vpow2.f32 %v324_v39 }
 0x477   :  { %v379_v44 = vsel %vm319_vm9, %v1895_v43, 0.0 }
 0x478   :  { %380 = vadd.xlane.f32.xlu1 %v379_v44 }
 0x47c   :  { %v1897_v47 = vpop.eup %1896 }
 0x47d   :  { %v326_v48 = vsel %vm319_vm9, %v1897_v47, 0.0 }
 0x47e   :  { %327 = vadd.xlane.f32.xlu0 %v326_v48 }
 0x483   :  { %v477_v49 = vpop.xlane.xlu1 %476 }
 0x484   :  { %v478_v50 = vsub.f32 %v472_v26, %v477_v49 }
 0x486   :  { %v479_v52 = vmul.f32 1.442695, %v478_v50 }
 0x488   :  { %1898 = vpow2.f32 %v479_v52 }
 0x489   :  { %v426_v53 = vpop.xlane.xlu2 %425 }
 0x48a   :  { %v427_v54 = vsub.f32 %v421_v30, %v426_v53  ;;  %v1599_v53 = vld [vmem:[%s2550_s12 + $0x30] sm:$0xf] }
 0x48c   :  { %v428_v56 = vmul.f32 1.442695, %v427_v54  ;;  %v1835_v54 = vld [vmem:[%s2550_s12 + $0x34] sm:$0xf0] }
 0x48e   :  { %v1899_v57 = vpop.eup %1898  ;;  %1900 = vpow2.f32 %v428_v56  ;;  %v1600_v56 = vor.u32 %v1835_v54, %v1599_v53 }
 0x48f   :  { %v481_v59 = vsel %vm319_vm9, %v1899_v57, 0.0 }
 0x490   :  { %482 = vadd.xlane.f32.xlu0 %v481_v59 }
 0x491   :  { %v333_v60 = vpop.permute.xlu2 %332 }
 0x492   :  { %v339_v61 = vsel %vm337_vm10, %v333_v60, 0  ;;  %v1591_v60 = vld [vmem:[%s2550_s12 + $0x20] sm:$0xf] }
 0x493   :  { %348 = vmatpush.bf16.msra.mxu2 %v339_v61 }
 0x494   :  { %v1901_v62 = vpop.eup %1900 }
 0x495   :  { %v430_v63 = vsel %vm319_vm9, %v1901_v62, 0.0 }
 0x496   :  { %431 = vadd.xlane.f32.xlu1 %v430_v63 }
 0x497   :  { %395 = vmatpush.bf16.msrb.mxu2 %v339_v61  ;;  %v1833_v61 = vld [vmem:[%s2550_s12 + $0x24] sm:$0xf0] }
 0x498   :  { %v1592_v63 = vor.u32 %v1833_v61, %v1591_v60 }
 0x4a4   :  { %436 = vrot.lane.b32.xlu0 %v2159_v46, %s1976_s1 }
 0x4eb   :  { %v381_v3 = vpop.xlane.xlu1 %380 }
 0x4f1   :  { %v328_v0 = vpop.xlane.xlu0 %327 }
 0x4f2   :  { %1902 = vrcp.f32 %v328_v0  ;;  %v1593_v0 = vld [vmem:[%s2550_s12 + $0x28] sm:$0xf0] }
 0x4f3   :  { %1904 = vrcp.f32 %v381_v3  ;;  %v1831_v3 = vld [vmem:[%s2550_s12 + $0x14] sm:$0xf0] }
 0x4f8   :  { %v1903_v1 = vpop.eup %1902 }
 0x4f9   :  { %v330_v2 = vmul.f32 %v1903_v1, %v1897_v47  ;;  %v1905_v5 = vpop.eup %1904 }
 0x4fa   :  { %v383_v6 = vmul.f32 %v1905_v5, %v1895_v43 }
 0x4fb   :  { %v331_v4 = vpack.c.bf16 %v330_v2, %v330_v2  ;;  %v1583_v2 = vld [vmem:[%s2550_s12 + $0x10] sm:$0xf] }
 0x4fc   :  { %v384_v10 = vpack.c.bf16 %v383_v6, %v383_v6  ;;  %v1584_v5 = vor.u32 %v1831_v3, %v1583_v2  ;;  %v1585_v6 = vld [vmem:[%s2550_s12 + $0x18] sm:$0xf0] }
 0x4fd   :  { %1549 = vmatmul.msk.bf16.vlgmr.msra.gmra.mxu2 %vm319_vm9, %v331_v4  ;;  %v1830_v4 = vld [vmem:[%s2550_s12 + $0x14] sm:$0xf] }
 0x503   :  { %v483_v9 = vpop.xlane.xlu0 %482 }
 0x509   :  { %v432_v8 = vpop.xlane.xlu1 %431 }
 0x50a   :  { %1906 = vrcp.f32 %v432_v8  ;;  %v1588_v8 = vor.u32 %v1830_v4, %v1585_v6  ;;  %v1847_v4 = vld [vmem:[%s2546_s8 + $0x38] sm:$0xff]  ;;  %v1844_v6 = vld [vmem:[%s2546_s8 + $0x20] sm:$0xff] }
 0x50b   :  { %1908 = vrcp.f32 %v483_v9  ;;  %v1575_v9 = vld [vmem:[%s2550_s12] sm:$0xf]  ;;  %837 = vmatpush.bf16.msra.mxu3 %v1847_v4 }
 0x50d   :  { %1551 = vmatmul.msk.bf16.vlgmr.msrb.gmra.mxu2 %vm319_vm9, %v384_v10  ;;  %v1829_v10 = vld [vmem:[%s2550_s12 + $0x4] sm:$0xf0] }
 0x510   :  { %v1907_v11 = vpop.eup %1906 }
 0x511   :  { %v1909_v46 = vpop.eup %1908  ;;  %v434_v12 = vmul.f32 %v1907_v11, %v1901_v62  ;;  %v1832_v62 = vld [vmem:[%s2550_s12 + $0x24] sm:$0xf] }
 0x512   :  { %v485_v14 = vmul.f32 %v1909_v46, %v1899_v57  ;;  %v1601_v57 = vld [vmem:[%s2550_s12 + $0x38] sm:$0xf0]  ;;  %v1596_v1 = vor.u32 %v1832_v62, %v1593_v0  ;;  %v1828_v11 = vld [vmem:[%s2550_s12 + $0x4] sm:$0xf]  ;;  %v1576_v46 = vor.u32 %v1829_v10, %v1575_v9 }
 0x513   :  { %v435_v16 = vpack.c.bf16 %v434_v12, %v434_v12  ;;  %v1577_v12 = vld [vmem:[%s2550_s12 + $0x8] sm:$0xf0] }
 0x514   :  { %v486_v17 = vpack.c.bf16 %v485_v14, %v485_v14 }
 0x516   :  { %v437_v13 = vpop.permute.xlu0 %436 }
 0x517   :  { %v442_v15 = vsel %vm337_vm10, %v437_v13, 0  ;;  %v1580_v13 = vor.u32 %v1828_v11, %v1577_v12 }
 0x518   :  { %451 = vmatpush.bf16.msra.mxu0 %v442_v15  ;;  %497 = vmatpush.bf16.msra.mxu2 %v442_v15 }
 0x51b   :  { %1553 = vmatmul.msk.bf16.vlgmr.msra.gmra.mxu0 %vm319_vm9, %v435_v16 }
 0x51c   :  { %646 = vmatpush.bf16.msrb.mxu0 %v1600_v56 }
 0x51d   :  { %1555 = vmatmul.msk.bf16.vlgmr.msra.gmra.mxu2 %vm319_vm9, %v486_v17 }
 0x520   :  { %647 = vmatpush.bf16.msrb.mxu0 %v1592_v63 }
 0x524   :  { %648 = vmatpush.bf16.msrb.mxu0 %v1584_v5  ;;  %v1846_v5 = vld [vmem:[%s2546_s8 + $0x30] sm:$0xff] }
 0x525   :  { %838 = vmatpush.bf16.msra.mxu3 %v1846_v5 }
 0x528   :  { %649 = vmatpush.bf16.msrb.mxu0 %v1576_v46 }
 0x52c   :  { %855 = vmatpush.bf16.msra.mxu0 %v2109_v22 }
 0x530   :  { %856 = vmatpush.bf16.msra.mxu0 %v2119_v24  ;;  %v1885_v24 = vld [vmem:[%s2549_s11] ss:$0 sm:$0xff] }
 0x534   :  { %857 = vmatpush.bf16.msra.mxu0 %v2126_v28 }
 0x538   :  { %858 = vmatpush.bf16.msra.mxu0 %v2137_v40  ;;  %v1843_v40 = vld [vmem:[%s2551_s13 + $0x38] sm:$0xff] }
 0x539   :  { %754 = vmatpush.bf16.msrb.mxu2 %v1843_v40 }
 0x580   :  { %v350_v18 = vpop.f32.mrf.mxu2 }
 0x588   :  { %v352_v19 = vpop.f32.mrf.mxu2 }
 0x590   :  { %v397_v20 = vpop.f32.mrf.mxu2 }
 0x591   :  { %504 = vrot.lane.b32.xlu1 %v397_v20, %s1976_s1 }
 0x598   :  { %v399_v25 = vpop.f32.mrf.mxu2  ;;  %v453_v26 = vpop.f32.mrf.mxu0 }
 0x599   :  { %508 = vrot.lane.b32.xlu2 %v453_v26, %s1975_s19 }
 0x5a0   :  { %v455_v27 = vpop.f32.mrf.mxu0  ;;  %v499_v29 = vpop.f32.mrf.mxu2 }
 0x5a1   :  { %512 = vrot.lane.b32.xlu2 %v499_v29, %s1970_s2  ;;  %v1842_v27 = vld [vmem:[%s2551_s13 + $0x30] sm:$0xff]  ;;  %v1841_v29 = vld [vmem:[%s2551_s13 + $0x28] sm:$0xff] }
 0x5a2   :  { %755 = vmatpush.bf16.msrb.mxu2 %v1842_v27 }
 0x5a6   :  { %756 = vmatpush.bf16.msrb.mxu2 %v1841_v29 }
 0x5a8   :  { %v501_v30 = vpop.f32.mrf.mxu2 }
 0x5a9   :  { %v1840_v30 = vld [vmem:[%s2551_s13 + $0x20] sm:$0xff] }
 0x5aa   :  { %757 = vmatpush.bf16.msrb.mxu2 %v1840_v30 }
 0x5ae   :  { %758 = vmatpush.bf16.msrb.mxu2 %v1839_v31 }
 0x5b2   :  { %759 = vmatpush.bf16.msrb.mxu2 %v1838_v32 }
 0x5b6   :  { %760 = vmatpush.bf16.msrb.mxu2 %v1837_v33 }
 0x5ba   :  { %761 = vmatpush.bf16.msrb.mxu2 %v1836_v34 }
 0x5f3   :  { %v509_v35 = vpop.permute.xlu2 %508 }
 0x5fb   :  { %v513_v38 = vpop.permute.xlu2 %512 }
 0x603   :  { %v505_v36 = vpop.permute.xlu1 %504 }
 0x604   :  { %v515_v37 = vsel %vm299_vm7, %v350_v18, %v505_v36 }
 0x605   :  { %v516_v39 = vsel %vm271_vm6, %v515_v37, %v509_v35 }
 0x606   :  { %v517_v43 = vsel %vm87_vm0, %v516_v39, %v513_v38 }
 0x607   :  { %v526_v44 = vpack.c.bf16 %v517_v43, %v517_v43 }
 0x609   :  { %1572 = vmatmul.msk.bf16.vlgmr.msrb.gmra.mxu3 %vm126_vm1, %v526_v44 }
 0x68c   :  { %v563_v47 = vpop.f32.mrf.mxu3 }
 0x68d   :  { %v2233_v48 = vadd.f32 %v563_v47, %v2084_v7  ;;  %v1834_v7 = vld [vmem:[%s2550_s12 + $0x34] sm:$0xf] }
 0x68e   :  { %v1604_v59 = vor.u32 %v1834_v7, %v1601_v57 }
 0x68f   :  { %v569_v49 = vmul.f32 %v2233_v48, %v2233_v48 }
 0x690   :  { %659 = vmatpush.bf16.msrb.mxu1 %v1604_v59 }
 0x691   :  { %v570_v50 = vsel %vm126_vm1, %v569_v49, 0.0 }
 0x692   :  { %571 = vadd.xlane.f32.xlu0 %v570_v50 }
 0x694   :  { %v565_v52 = vpop.f32.mrf.mxu3  ;;  %660 = vmatpush.bf16.msrb.mxu1 %v1596_v1 }
 0x698   :  { %661 = vmatpush.bf16.msrb.mxu1 %v1588_v8 }
 0x69c   :  { %662 = vmatpush.bf16.msrb.mxu1 %v1580_v13 }
 0x6a0   :  { %879 = vmatpush.bf16.msra.mxu1 %v2143_v41 }
 0x6a4   :  { %880 = vmatpush.bf16.msra.mxu1 %v2149_v42 }
 0x705   :  { %v572_v14 = vpop.xlane.xlu0 %571 }
 0x706   :  { %v573_v15 = vmul.f32 %v572_v14, %v2111_v23 }
 0x708   :  { %v574_v16 = vadd.f32 1e-06, %v573_v15 }
 0x70a   :  { %1910 = vrsqrt.f32 %v574_v16  ;;  %vm581_vm12 = vweird.f32 %v574_v16 }
 0x710   :  { %v1911_v17 = vpop.eup %1910 }
 0x711   :  { %v576_v18 = vmul.f32 %v1911_v17, %v574_v16  ;;  %vm582_vm11 = vweird.f32 %v1911_v17  ;;  %v1886_v16 = vld [vmem:[%s2545_s7 + $0x1] ss:$0 sm:$0xff] }
 0x712   :  { %vm583_vm13 = vmor %vm581_vm12, %vm582_vm11  ;;  %vm920_vm11 = vcmask 57344  }
 0x713   :  { %v577_v19 = vmul.f32 %v1911_v17, %v576_v18 }
 0x715   :  { %v578_v20 = vmul.f32 0.5, %v577_v19 }
 0x717   :  { %v579_v22 = vsub.f32 1.5, %v578_v20 }
 0x719   :  { %v580_v41 = vmul.f32 %v1911_v17, %v579_v22  ;;  %v1887_v22 = vld [vmem:[%s2547_s9 + $0x1] ss:$0 sm:$0xff] }
 0x71b   :  { %v584_v42 = vsel %vm583_vm13, %v1911_v17, %v580_v41 }
 0x71c   :  { %v585_v25 = vmul.f32 %v584_v42, %v2233_v48 }
 0x71e   :  { %v589_v28 = vmul.f32 %v1885_v24, %v585_v25 }
 0x720   :  { %v598_v26 = vpack.c.bf16 %v589_v28, %v589_v28 }
 0x722   :  { %1605 = vmatmul.msk.bf16.vlgmr.msrb.gmra.mxu0 %vm126_vm1, %v598_v26  ;;  %1606 = vmatmul.msk.bf16.vlgmr.msrb.gmra.mxu1 %vm126_vm1, %v598_v26 }
 0x79f   :  { %v651_v35 = vpop.f32.mrf.mxu0  ;;  %v664_v36 = vpop.f32.mrf.mxu1 }
 0x7a0   :  { %v1607_v37 = vmul.f32 -1.442695, %v651_v35 }
 0x7a2   :  { %1912 = vpow2.f32 %v1607_v37 }
 0x7a7   :  { %v653_v38 = vpop.f32.mrf.mxu0  ;;  %v666_v39 = vpop.f32.mrf.mxu1 }
 0x7a8   :  { %v1913_v43 = vpop.eup %1912 }
 0x7a9   :  { %v671_v44 = vadd.f32 1.0, %v1913_v43 }
 0x7ab   :  { %1914 = vrcp.f32 %v671_v44  ;;  %v683_v52 = vand.u32 2147483648, %v671_v44  ;;  %v681_v54 = vand.u32 2147483647, %v671_v44  ;;  %vm677_vm15 = vweird.f32 %v671_v44 }
 0x7ad   :  { %v684_v56 = vor.u32 1.1754944e-38, %v683_v52  ;;  %vm682_vm3 = vcmp.eq.f32.partialorder %v681_v54, 8.507059e+37 }
 0x7b1   :  { %v1915_v47 = vpop.eup %1914 }
 0x7b2   :  { %v673_v49 = vmul.f32 %v1915_v47, %v671_v44  ;;  %vm678_vm14 = vweird.f32 %v1915_v47 }
 0x7b3   :  { %vm679_vm2 = vmor %vm677_vm15, %vm678_vm14 }
 0x7b4   :  { %v674_v50 = vsub.f32 1.0, %v673_v49 }
 0x7b6   :  { %v675_v53 = vmul.f32 %v1915_v47, %v674_v50 }
 0x7b8   :  { %v676_v7 = vadd.f32 %v1915_v47, %v675_v53 }
 0x7ba   :  { %v680_v57 = vsel %vm679_vm2, %v1915_v47, %v676_v7 }
 0x7bb   :  { %v685_v59 = vsel %vm682_vm3, %v684_v56, %v680_v57 }
 0x7bc   :  { %v687_v60 = vmul.f32 %v685_v59, %v651_v35 }
 0x7be   :  { %v688_v61 = vmul.f32 %v687_v60, %v664_v36 }
 0x7c0   :  { %v705_v62 = vpack.c.bf16 %v688_v61, %v688_v61 }
 0x7c2   :  { %762 = vmatmul.bf16.vlgmr.msrb.gmra.mxu2 %v705_v62 }
 0x845   :  { %v763_v63 = vpop.f32.mrf.mxu2 }
 0x846   :  { %v2324_v0 = vadd.f32 %v763_v63, %v2233_v48  ;;  %v1845_v48 = vld [vmem:[%s2546_s8 + $0x28] sm:$0xff] }
 0x847   :  { %839 = vmatpush.bf16.msra.mxu3 %v1845_v48 }
 0x848   :  { %v770_v1 = vmul.f32 %v2324_v0, %v2324_v0 }
 0x84a   :  { %v771_v2 = vsel %vm126_vm1, %v770_v1, 0.0 }
 0x84b   :  { %772 = vadd.xlane.f32.xlu2 %v771_v2  ;;  %840 = vmatpush.bf16.msra.mxu3 %v1844_v6 }
 0x84d   :  { %v765_v3 = vpop.f32.mrf.mxu2 }
 0x8be   :  { %v773_v8 = vpop.xlane.xlu2 %772 }
 0x8bf   :  { %v774_v9 = vmul.f32 %v773_v8, %v2111_v23 }
 0x8c1   :  { %v775_v10 = vadd.f32 1e-06, %v774_v9 }
 0x8c3   :  { %1916 = vrsqrt.f32 %v775_v10  ;;  %vm782_vm5 = vweird.f32 %v775_v10 }
 0x8c9   :  { %v1917_v11 = vpop.eup %1916 }
 0x8ca   :  { %v777_v46 = vmul.f32 %v1917_v11, %v775_v10  ;;  %vm783_vm4 = vweird.f32 %v1917_v11 }
 0x8cb   :  { %vm784_vm8 = vmor %vm782_vm5, %vm783_vm4  ;;  %vm1470_vm5 = vcmask 253952  }
 0x8cc   :  { %v778_v12 = vmul.f32 %v1917_v11, %v777_v46 }
 0x8ce   :  { %v779_v13 = vmul.f32 0.5, %v778_v12 }
 0x8d0   :  { %v780_v14 = vsub.f32 1.5, %v779_v13 }
 0x8d2   :  { %v781_v15 = vmul.f32 %v1917_v11, %v780_v14 }
 0x8d4   :  { %v785_v17 = vsel %vm784_vm8, %v1917_v11, %v781_v15 }
 0x8d5   :  { %v786_v18 = vmul.f32 %v785_v17, %v2324_v0 }
 0x8d7   :  { %v790_v19 = vmul.f32 %v1886_v16, %v786_v18 }
 0x8d9   :  { %v800_v20 = vpack.c.bf16 %v790_v19, %v790_v19 }
 0x8db   :  { %1666 = vmatmul.msk.bf16.vlgmr.msra.gmra.mxu3 %vm126_vm1, %v800_v20 }
 0x95e   :  { %v842_v41 = vpop.f32.mrf.mxu3 }
 0x95f   :  { %v2350_v24 = vadd.f32 %v1887_v22, %v842_v41 }
 0x961   :  { %v2354_v42 = vpack.c.bf16 %v2350_v24, %v2350_v24  ;;  %v846_v40 = vmul.f32 %v2350_v24, %v2104_v21  ;;  %v866_v21 = vmul.f32 %v2350_v24, %v2173_v55 }
 0x963   :  { %868 = vrot.lane.b32.xlu1 %v2354_v42, %s1969_s30  ;;  %1667 = vmatmul.msk.bf16.vlgmr.msra.gmra.mxu0 %vm126_vm1, %v2354_v42 }
 0x966   :  { %v844_v25 = vpop.f32.mrf.mxu3 }
 0x9d5   :  { %v869_v28 = vpop.permute.xlu1 %868 }
 0x9d6   :  { %1668 = vmatmul.msk.bf16.vlgmr.msra.gmra.mxu1 %vm271_vm6, %v869_v28 }
 0x9e0   :  { %v860_v26 = vpop.f32.mrf.mxu0 }
 0x9e1   :  { %v864_v27 = vmul.f32 %v860_v26, %v2169_v51 }
 0x9e3   :  { %v865_v29 = vadd.f32 %v864_v27, %v846_v40 }
 0x9e5   :  { %v892_v30 = vpack.c.bf16 %v865_v29, %v865_v29 }
 0x9e7   :  { %v895_v31 = vshrl.u32 %v892_v30, 16 }
 0x9e8   :  { %v862_v32 = vpop.f32.mrf.mxu0 }
 0x9e9   :  { %v897_v33 = vrot.slane %v895_v31, 3 }
 0x9eb   :  { %1056 = vrot.lane.b32.xlu2 %v897_v33, %s1971_s29  ;;  %1000 = vrot.lane.b32.xlu0 %v897_v33, %s1973_s18 }
 0xa45   :  { %v1057_v49 = vpop.permute.xlu2 %1056 }
 0xa53   :  { %v882_v34 = vpop.f32.mrf.mxu1 }
 0xa54   :  { %v886_v35 = vmul.f32 %v882_v34, %v2169_v51 }
 0xa56   :  { %888 = vrot.lane.b32.xlu1 %v886_v35, %s1969_s30 }
 0xa5b   :  { %v884_v36 = vpop.f32.mrf.mxu1 }
 0xa5d   :  { %v1001_v50 = vpop.permute.xlu0 %1000 }
 0xac8   :  { %v889_v37 = vpop.permute.xlu1 %888 }
 0xac9   :  { %v2370_v38 = vadd.f32 %v889_v37, %v866_v21 }
 0xacb   :  { %v893_v39 = vpack.c.bf16 %v2370_v38, %v2370_v38 }
 0xacd   :  { %899 = vrot.lane.b32.xlu1 %v893_v39, %s1969_s30 }
 0xad5   :  { %954 = vrot.lane.b32.xlu1 %v897_v33, %s1972_s0 }
 0xadd   :  { %1002 = vrot.lane.b32.xlu1 %v893_v39, %s1970_s2 }
 0xb3f   :  { %v900_v43 = vpop.permute.xlu1 %899 }
 0xb40   :  { %v905_v51 = vsel %vm299_vm7, %v900_v43, 0 }
 0xb41   :  { %914 = vmatpush.bf16.xpose.msrb.mxu3 %v905_v51  ;;  %966 = vmatpush.bf16.xpose.msrb.mxu1 %v905_v51 }
 0xb47   :  { %v955_v44 = vpop.permute.xlu1 %954 }
 0xb48   :  { %1669 = vmatmul.msk.bf16.vlgmr.msrb.gmra.mxu3 %vm299_vm7, %v897_v33  ;;  %1671 = vmatmul.msk.bf16.vlgmr.msrb.gmra.mxu1 %vm299_vm7, %v955_v44 }
 0xb4f   :  { %v1003_v55 = vpop.permute.xlu1 %1002 }
 0xb50   :  { %v1008_v47 = vsel %vm299_vm7, %v1003_v55, 0 }
 0xb51   :  { %1017 = vmatpush.bf16.xpose.msra.mxu3 %v1008_v47  ;;  %1068 = vmatpush.bf16.xpose.msra.mxu1 %v1008_v47 }
 0xb58   :  { %1673 = vmatmul.msk.bf16.vlgmr.msra.gmra.mxu3 %vm299_vm7, %v1001_v50  ;;  %1675 = vmatmul.msk.bf16.vlgmr.msra.gmra.mxu1 %vm299_vm7, %v1057_v49 }
 0xbc5   :  { %v968_v52 = vpop.f32.mrf.mxu1 }
 0xbc6   :  { %v972_v53 = vsel %vm920_vm11, %v968_v52, -inf }
 0xbc7   :  { %973 = vmax.xlane.f32.xlu1 %v972_v53 }
 0xbcb   :  { %v916_v54 = vpop.f32.mrf.mxu3 }
 0xbcc   :  { %v921_v7 = vsel %vm920_vm11, %v916_v54, -inf }
 0xbcd   :  { %v970_v56 = vpop.f32.mrf.mxu1  ;;  %922 = vmax.xlane.f32.xlu0 %v921_v7  ;;  %v1850_v7 = vld [vmem:[%s2548_s10 + $0x30] sm:$0xff] }
 0xbce   :  { %v1849_v56 = vld [vmem:[%s2548_s10 + $0x28] sm:$0xff] }
 0xbd3   :  { %v918_v57 = vpop.f32.mrf.mxu3 }
 0xbd5   :  { %v1070_v59 = vpop.f32.mrf.mxu1 }
 0xbd6   :  { %v1074_v60 = vsel %vm920_vm11, %v1070_v59, -inf }
 0xbd7   :  { %1075 = vmax.xlane.f32.xlu2 %v1074_v60 }
 0xbdb   :  { %v1019_v61 = vpop.f32.mrf.mxu3 }
 0xbdc   :  { %v1023_v62 = vsel %vm920_vm11, %v1019_v61, -inf }
 0xbdd   :  { %v1072_v63 = vpop.f32.mrf.mxu1  ;;  %1024 = vmax.xlane.f32.xlu1 %v1023_v62 }
 0xbe3   :  { %v1021_v1 = vpop.f32.mrf.mxu3 }
 0xc3a   :  { %v974_v2 = vpop.xlane.xlu1 %973 }
 0xc3b   :  { %v975_v3 = vsub.f32 %v968_v52, %v974_v2 }
 0xc3d   :  { %v976_v4 = vmul.f32 1.442695, %v975_v3 }
 0xc3f   :  { %1918 = vpow2.f32 %v976_v4 }
 0xc40   :  { %v923_v5 = vpop.xlane.xlu0 %922 }
 0xc41   :  { %v924_v48 = vsub.f32 %v916_v54, %v923_v5  ;;  %v1851_v54 = vld [vmem:[%s2548_s10 + $0x38] sm:$0xff] }
 0xc42   :  { %1158 = vmatpush.bf16.msrb.mxu3 %v1851_v54  ;;  %v1866_v54 = vld [vmem:[%s2551_s13 + $0x70] sm:$0xff] }
 0xc43   :  { %v925_v6 = vmul.f32 1.442695, %v924_v48 }
 0xc45   :  { %v1919_v8 = vpop.eup %1918  ;;  %1920 = vpow2.f32 %v925_v6 }
 0xc46   :  { %v978_v9 = vsel %vm920_vm11, %v1919_v8, 0.0  ;;  %1159 = vmatpush.bf16.msrb.mxu3 %v1850_v7  ;;  %v1865_v7 = vld [vmem:[%s2551_s13 + $0x68] sm:$0xff] }
 0xc47   :  { %979 = vadd.xlane.f32.xlu1 %v978_v9 }
 0xc4a   :  { %v1076_v10 = vpop.xlane.xlu2 %1075  ;;  %1160 = vmatpush.bf16.msrb.mxu3 %v1849_v56  ;;  %v1864_v56 = vld [vmem:[%s2551_s13 + $0x60] sm:$0xff] }
 0xc4b   :  { %v1921_v11 = vpop.eup %1920  ;;  %v1077_v46 = vsub.f32 %v1070_v59, %v1076_v10 }
 0xc4c   :  { %v927_v12 = vsel %vm920_vm11, %v1921_v11, 0.0 }
 0xc4d   :  { %v1078_v13 = vmul.f32 1.442695, %v1077_v46  ;;  %928 = vadd.xlane.f32.xlu0 %v927_v12  ;;  %v1739_v12 = vld [vmem:[%s2550_s12 + $0x78] sm:$0xf0] }
 0xc4f   :  { %1922 = vpow2.f32 %v1078_v13 }
 0xc50   :  { %v1025_v14 = vpop.xlane.xlu1 %1024 }
 0xc51   :  { %v1026_v15 = vsub.f32 %v1019_v61, %v1025_v14  ;;  %v1729_v14 = vld [vmem:[%s2550_s12 + $0x60] sm:$0xf] }
 0xc53   :  { %v1027_v16 = vmul.f32 1.442695, %v1026_v15  ;;  %v1857_v15 = vld [vmem:[%s2550_s12 + $0x64] sm:$0xf0] }
 0xc55   :  { %v1923_v17 = vpop.eup %1922  ;;  %1924 = vpow2.f32 %v1027_v16  ;;  %v1856_v16 = vld [vmem:[%s2550_s12 + $0x64] sm:$0xf] }
 0xc56   :  { %v1080_v18 = vsel %vm920_vm11, %v1923_v17, 0.0 }
 0xc57   :  { %1081 = vadd.xlane.f32.xlu0 %v1080_v18  ;;  %v1731_v18 = vld [vmem:[%s2550_s12 + $0x68] sm:$0xf0] }
 0xc5b   :  { %v1925_v19 = vpop.eup %1924 }
 0xc5c   :  { %v1029_v20 = vsel %vm920_vm11, %v1925_v19, 0.0 }
 0xc5d   :  { %1030 = vadd.xlane.f32.xlu2 %v1029_v20  ;;  %v1721_v20 = vld [vmem:[%s2550_s12 + $0x50] sm:$0xf] }
 0xc60   :  { %933 = vrot.lane.b32.xlu1 %v2354_v42, %s1975_s19 }
 0xc6b   :  { %1035 = vrot.lane.b32.xlu0 %v2354_v42, %s1976_s1 }
 0xcba   :  { %v980_v22 = vpop.xlane.xlu1 %979 }
 0xcbb   :  { %1926 = vrcp.f32 %v980_v22  ;;  %v1855_v22 = vld [vmem:[%s2550_s12 + $0x54] sm:$0xf0] }
 0xcc0   :  { %v929_v41 = vpop.xlane.xlu0 %928 }
 0xcc1   :  { %1928 = vrcp.f32 %v929_v41  ;;  %v1927_v25 = vpop.eup %1926  ;;  %v1854_v41 = vld [vmem:[%s2550_s12 + $0x54] sm:$0xf] }
 0xcc2   :  { %v982_v26 = vmul.f32 %v1927_v25, %v1919_v8  ;;  %v1722_v25 = vor.u32 %v1855_v22, %v1721_v20  ;;  %v1871_v20 = vld [vmem:[%s2553_s15 + $0x18] sm:$0xff]  ;;  %v1870_v22 = vld [vmem:[%s2553_s15 + $0x10] sm:$0xff] }
 0xcc4   :  { %v983_v31 = vpack.c.bf16 %v982_v26, %v982_v26 }
 0xcc7   :  { %v1929_v28 = vpop.eup %1928 }
 0xcc8   :  { %v931_v40 = vmul.f32 %v1929_v28, %v1921_v11  ;;  %v1723_v28 = vld [vmem:[%s2550_s12 + $0x58] sm:$0xf0] }
 0xcc9   :  { %v1726_v26 = vor.u32 %v1854_v41, %v1723_v28  ;;  %v1869_v41 = vld [vmem:[%s2553_s15 + $0x8] sm:$0xff] }
 0xcca   :  { %v1082_v30 = vpop.xlane.xlu0 %1081  ;;  %v932_v32 = vpack.c.bf16 %v931_v40, %v931_v40  ;;  %v1713_v40 = vld [vmem:[%s2550_s12 + $0x40] sm:$0xf] }
 0xccb   :  { %1930 = vrcp.f32 %v1082_v30 }
 0xcd0   :  { %v1031_v33 = vpop.xlane.xlu2 %1030 }
 0xcd1   :  { %1932 = vrcp.f32 %v1031_v33  ;;  %v1931_v42 = vpop.eup %1930 }
 0xcd2   :  { %v934_v27 = vpop.permute.xlu1 %933  ;;  %v1084_v21 = vmul.f32 %v1931_v42, %v1923_v17  ;;  %v1730_v17 = vor.u32 %v1857_v15, %v1729_v14 }
 0xcd3   :  { %v939_v29 = vsel %vm337_vm10, %v934_v27, 0  ;;  %v1853_v27 = vld [vmem:[%s2550_s12 + $0x44] sm:$0xf0] }
 0xcd4   :  { %948 = vmatpush.bf16.msrb.mxu0 %v939_v29  ;;  %994 = vmatpush.bf16.msra.mxu2 %v939_v29  ;;  %v1085_v39 = vpack.c.bf16 %v1084_v21, %v1084_v21  ;;  %v1852_v29 = vld [vmem:[%s2550_s12 + $0x44] sm:$0xf]  ;;  %v1714_v30 = vor.u32 %v1853_v27, %v1713_v40 }
 0xcd7   :  { %1670 = vmatmul.msk.bf16.vlgmr.msrb.gmra.mxu0 %vm319_vm9, %v932_v32  ;;  %1672 = vmatmul.msk.bf16.vlgmr.msra.gmra.mxu2 %vm319_vm9, %v983_v31  ;;  %v1933_v35 = vpop.eup %1932  ;;  %v1715_v31 = vld [vmem:[%s2550_s12 + $0x48] sm:$0xf0] }
 0xcd8   :  { %v1033_v37 = vmul.f32 %v1933_v35, %v1925_v19  ;;  %v1734_v19 = vor.u32 %v1856_v16, %v1731_v18  ;;  %v1718_v32 = vor.u32 %v1852_v29, %v1715_v31 }
 0xcda   :  { %v1034_v43 = vpack.c.bf16 %v1033_v37, %v1033_v37 }
 0xcdd   :  { %v1036_v34 = vpop.permute.xlu0 %1035 }
 0xcde   :  { %v1041_v36 = vsel %vm337_vm10, %v1036_v34, 0 }
 0xcdf   :  { %1050 = vmatpush.bf16.msra.mxu0 %v1041_v36  ;;  %1096 = vmatpush.bf16.msrb.mxu2 %v1041_v36 }
 0xce7   :  { %1674 = vmatmul.msk.bf16.vlgmr.msra.gmra.mxu0 %vm319_vm9, %v1034_v43  ;;  %1676 = vmatmul.msk.bf16.vlgmr.msrb.gmra.mxu2 %vm319_vm9, %v1085_v39  ;;  %vm1392_vm9 = vcmask 785408  }
 0xd54   :  { %v950_v51 = vpop.f32.mrf.mxu0 }
 0xd5a   :  { %v996_v44 = vpop.f32.mrf.mxu2 }
 0xd5b   :  { %1103 = vrot.lane.b32.xlu2 %v996_v44, %s1976_s1 }
 0xd5c   :  { %v952_v55 = vpop.f32.mrf.mxu0 }
 0xd62   :  { %v998_v47 = vpop.f32.mrf.mxu2 }
 0xd64   :  { %v1052_v49 = vpop.f32.mrf.mxu0 }
 0xd65   :  { %1107 = vrot.lane.b32.xlu1 %v1052_v49, %s1975_s19 }
 0xd6a   :  { %v1098_v50 = vpop.f32.mrf.mxu2 }
 0xd6b   :  { %1111 = vrot.lane.b32.xlu0 %v1098_v50, %s1970_s2 }
 0xd6c   :  { %v1054_v52 = vpop.f32.mrf.mxu0 }
 0xd72   :  { %v1100_v53 = vpop.f32.mrf.mxu2 }
 0xd73   :  { %1383 = vrot.lane.b32.xlu0 %v2177_v58, %s1969_s30  ;;  %v1848_v58 = vld [vmem:[%s2548_s10 + $0x20] sm:$0xff]  ;;  %v1867_v53 = vld [vmem:[%s2551_s13 + $0x78] sm:$0xff] }
 0xd74   :  { %1161 = vmatpush.bf16.msrb.mxu3 %v1848_v58  ;;  %1365 = vmatpush.bf16.msra.mxu2 %v1867_v53  ;;  %v1863_v58 = vld [vmem:[%s2551_s13 + $0x58] sm:$0xff] }
 0xd78   :  { %1366 = vmatpush.bf16.msra.mxu2 %v1866_v54  ;;  %1461 = vmatpush.bf16.msra.mxu3 %v1871_v20 }
 0xd7b   :  { %1387 = vrot.lane.b32.xlu0 %v2155_v45, %s1969_s30 }
 0xd7c   :  { %1367 = vmatpush.bf16.msra.mxu2 %v1865_v7  ;;  %1462 = vmatpush.bf16.msra.mxu3 %v1870_v22 }
 0xd80   :  { %1368 = vmatpush.bf16.msra.mxu2 %v1864_v56  ;;  %1463 = vmatpush.bf16.msra.mxu3 %v1869_v41 }
 0xd84   :  { %1369 = vmatpush.bf16.msra.mxu2 %v1863_v58 }
 0xdb5   :  { %v1104_v45 = vpop.permute.xlu2 %1103 }
 0xdb6   :  { %v1114_v59 = vsel %vm299_vm7, %v950_v51, %v1104_v45  ;;  %v1888_v51 = vld [vmem:[%s2549_s11 + $0x1] ss:$0 sm:$0xff]  ;;  %v1862_v45 = vld [vmem:[%s2551_s13 + $0x50] sm:$0xff] }
 0xdb7   :  { %1370 = vmatpush.bf16.msra.mxu2 %v1862_v45 }
 0xdd7   :  { %v1108_v57 = vpop.permute.xlu1 %1107 }
 0xdd8   :  { %v1115_v60 = vsel %vm271_vm6, %v1114_v59, %v1108_v57  ;;  %v1861_v57 = vld [vmem:[%s2551_s13 + $0x48] sm:$0xff]  ;;  %v1860_v59 = vld [vmem:[%s2551_s13 + $0x40] sm:$0xff] }
 0xdd9   :  { %1371 = vmatpush.bf16.msra.mxu2 %v1861_v57 }
 0xddd   :  { %v1112_v61 = vpop.permute.xlu0 %1111  ;;  %1372 = vmatpush.bf16.msra.mxu2 %v1860_v59 }
 0xdde   :  { %v1116_v62 = vsel %vm87_vm0, %v1115_v60, %v1112_v61  ;;  %vm1174_vm0 = vcmask 523271  }
 0xddf   :  { %v1126_v63 = vpack.c.bf16 %v1116_v62, %v1116_v62 }
 0xde1   :  { %1701 = vmatmul.msk.bf16.vlgmr.msrb.gmra.mxu3 %vm126_vm1, %v1126_v63 }
 0xde5   :  { %v1384_v1 = vpop.permute.xlu0 %1383 }
 0xded   :  { %v1388_v2 = vpop.permute.xlu0 %1387 }
 0xdee   :  { %v1390_v3 = vsel %vm271_vm6, %v1384_v1, %v1388_v2 }
 0xdef   :  { %v1391_v4 = vsel %vm126_vm1, %v1390_v3, %v2370_v38  ;;  %v1859_v38 = vld [vmem:[%s2550_s12 + $0x74] sm:$0xf0] }
 0xdf0   :  { %v1393_v5 = vsel %vm1392_vm9, %v1391_v4, %v2350_v24  ;;  %v1737_v24 = vld [vmem:[%s2550_s12 + $0x70] sm:$0xf] }
 0xdf1   :  { %1394 = vst [vmem:[%s2555_s17] sm:$0xff] %v1393_v5  ;;  %v1738_v46 = vor.u32 %v1859_v38, %v1737_v24 }
 0xdf3   :  { %1256 = vmatpush.bf16.msrb.mxu0 %v1738_v46 }
 0xdf7   :  { %1257 = vmatpush.bf16.msrb.mxu0 %v1730_v17 }
 0xdfb   :  { %1258 = vmatpush.bf16.msrb.mxu0 %v1722_v25 }
 0xdff   :  { %1259 = vmatpush.bf16.msrb.mxu0 %v1714_v30 }
 0xe64   :  { %v1163_v48 = vpop.f32.mrf.mxu3 }
 0xe65   :  { %v1168_v6 = vrot.slane %v1163_v48, 1 }
 0xe67   :  { %v2432_v8 = vadd.f32 %v1168_v6, %v2324_v0  ;;  %v1858_v0 = vld [vmem:[%s2550_s12 + $0x74] sm:$0xf] }
 0xe68   :  { %v1742_v13 = vor.u32 %v1858_v0, %v1739_v12 }
 0xe69   :  { %v1173_v9 = vmul.f32 %v2432_v8, %v2432_v8 }
 0xe6a   :  { %1269 = vmatpush.bf16.msrb.mxu1 %v1742_v13 }
 0xe6b   :  { %v1175_v10 = vsel %vm1174_vm0, %v1173_v9, 0.0 }
 0xe6c   :  { %1176 = vadd.xlane.f32.xlu1 %v1175_v10  ;;  %v1165_v11 = vpop.f32.mrf.mxu3 }
 0xe6e   :  { %1270 = vmatpush.bf16.msrb.mxu1 %v1734_v19 }
 0xe72   :  { %1271 = vmatpush.bf16.msrb.mxu1 %v1726_v26 }
 0xe76   :  { %1272 = vmatpush.bf16.msrb.mxu1 %v1718_v32 }
 0xedf   :  { %v1177_v33 = vpop.xlane.xlu1 %1176 }
 0xee0   :  { %v1178_v42 = vmul.f32 %v1177_v33, %v2111_v23  ;;  %v1889_v33 = vld [vmem:[%s2552_s14] ss:$0 sm:$0xff] }
 0xee2   :  { %v1179_v34 = vadd.f32 1e-06, %v1178_v42 }
 0xee4   :  { %1934 = vrsqrt.f32 %v1179_v34  ;;  %vm1186_vm7 = vweird.f32 %v1179_v34 }
 0xeea   :  { %v1935_v35 = vpop.eup %1934 }
 0xeeb   :  { %v1181_v36 = vmul.f32 %v1935_v35, %v1179_v34  ;;  %vm1187_vm6 = vweird.f32 %v1935_v35 }
 0xeec   :  { %vm1188_vm10 = vmor %vm1186_vm7, %vm1187_vm6 }
 0xeed   :  { %v1182_v21 = vmul.f32 %v1935_v35, %v1181_v36 }
 0xeef   :  { %v1183_v37 = vmul.f32 0.5, %v1182_v21 }
 0xef1   :  { %v1184_v39 = vsub.f32 1.5, %v1183_v37 }
 0xef3   :  { %v1185_v43 = vmul.f32 %v1935_v35, %v1184_v39 }
 0xef5   :  { %v1189_v44 = vsel %vm1188_vm10, %v1935_v35, %v1185_v43 }
 0xef6   :  { %v1190_v55 = vmul.f32 %v1189_v44, %v2432_v8 }
 0xef8   :  { %v1194_v47 = vmul.f32 %v1888_v51, %v1190_v55 }
 0xefa   :  { %v1204_v49 = vpack.c.bf16 %v1194_v47, %v1194_v47 }
 0xefc   :  { %v1206_v50 = vshrl.u32 %v1204_v49, 16 }
 0xefe   :  { %v1208_v52 = vrot.slane %v1206_v50, 3 }
 0xf00   :  { %1743 = vmatmul.msk.bf16.vlgmr.msrb.gmra.mxu0 %vm126_vm1, %v1208_v52  ;;  %1744 = vmatmul.msk.bf16.vlgmr.msrb.gmra.mxu1 %vm126_vm1, %v1208_v52 }
 0xf7d   :  { %v1261_v60 = vpop.f32.mrf.mxu0  ;;  %v1274_v61 = vpop.f32.mrf.mxu1 }
 0xf7e   :  { %v1745_v62 = vmul.f32 -1.442695, %v1261_v60 }
 0xf80   :  { %1936 = vpow2.f32 %v1745_v62 }
 0xf85   :  { %v1263_v63 = vpop.f32.mrf.mxu0  ;;  %v1276_v1 = vpop.f32.mrf.mxu1 }
 0xf86   :  { %v1937_v2 = vpop.eup %1936 }
 0xf87   :  { %v1281_v3 = vadd.f32 1.0, %v1937_v2 }
 0xf89   :  { %1938 = vrcp.f32 %v1281_v3  ;;  %v1293_v6 = vand.u32 2147483648, %v1281_v3  ;;  %v1291_v10 = vand.u32 2147483647, %v1281_v3  ;;  %vm1287_vm13 = vweird.f32 %v1281_v3 }
 0xf8b   :  { %v1294_v24 = vor.u32 1.1754944e-38, %v1293_v6  ;;  %vm1292_vm15 = vcmp.eq.f32.partialorder %v1291_v10, 8.507059e+37 }
 0xf8f   :  { %v1939_v4 = vpop.eup %1938 }
 0xf90   :  { %v1283_v5 = vmul.f32 %v1939_v4, %v1281_v3  ;;  %vm1288_vm12 = vweird.f32 %v1939_v4 }
 0xf91   :  { %vm1289_vm14 = vmor %vm1287_vm13, %vm1288_vm12 }
 0xf92   :  { %v1284_v48 = vsub.f32 1.0, %v1283_v5 }
 0xf94   :  { %v1285_v9 = vmul.f32 %v1939_v4, %v1284_v48 }
 0xf96   :  { %v1286_v11 = vadd.f32 %v1939_v4, %v1285_v9 }
 0xf98   :  { %v1290_v38 = vsel %vm1289_vm14, %v1939_v4, %v1286_v11 }
 0xf99   :  { %v1295_v0 = vsel %vm1292_vm15, %v1294_v24, %v1290_v38 }
 0xf9a   :  { %v1297_v46 = vmul.f32 %v1295_v0, %v1261_v60 }
 0xf9c   :  { %v1298_v12 = vmul.f32 %v1297_v46, %v1274_v61 }
 0xf9e   :  { %v1316_v13 = vpack.c.bf16 %v1298_v12, %v1298_v12 }
 0xfa0   :  { %1373 = vmatmul.bf16.vlgmr.msra.gmra.mxu2 %v1316_v13 }
0x1023   :  { %v1374_v14 = vpop.f32.mrf.mxu2 }
0x1024   :  { %v1379_v15 = vrot.slane %v1374_v14, 1 }
0x1026   :  { %v1381_v16 = vadd.f32 %v1379_v15, %v2432_v8  ;;  %v1868_v8 = vld [vmem:[%s2553_s15] sm:$0xff]  ;;  %s1977_s15 = smov [#allocation2]  }
0x1027   :  { %1464 = vmatpush.bf16.msra.mxu3 %v1868_v8  ;;  %s1477_s28 = sshll.u32 %s1977_s15, 4  ;;  %s1478_s28 = int_to_ptr.vmem [resolvable:$true] %s1477_s28 }
0x1028   :  { %v1396_v17 = vmul.f32 %v1381_v16, %v1381_v16 }
0x102a   :  { %v1397_v18 = vsel %vm1174_vm0, %v1396_v17, 0.0 }
0x102b   :  { %1398 = vadd.xlane.f32.xlu2 %v1397_v18  ;;  %v1376_v19 = vpop.f32.mrf.mxu2 }
0x109e   :  { %v1399_v25 = vpop.xlane.xlu2 %1398 }
0x109f   :  { %v1400_v28 = vmul.f32 %v1399_v25, %v2111_v23 }
0x10a1   :  { %v1401_v26 = vadd.f32 1e-06, %v1400_v28 }
0x10a3   :  { %1940 = vrsqrt.f32 %v1401_v26  ;;  %vm1408_vm3 = vweird.f32 %v1401_v26 }
0x10a9   :  { %v1941_v40 = vpop.eup %1940 }
0x10aa   :  { %v1403_v27 = vmul.f32 %v1941_v40, %v1401_v26  ;;  %vm1409_vm2 = vweird.f32 %v1941_v40 }
0x10ab   :  { %vm1410_vm4 = vmor %vm1408_vm3, %vm1409_vm2 }
0x10ac   :  { %v1404_v29 = vmul.f32 %v1941_v40, %v1403_v27 }
0x10ae   :  { %v1405_v30 = vmul.f32 0.5, %v1404_v29 }
0x10b0   :  { %v1406_v31 = vsub.f32 1.5, %v1405_v30 }
0x10b2   :  { %v1407_v32 = vmul.f32 %v1941_v40, %v1406_v31 }
0x10b4   :  { %v1411_v42 = vsel %vm1410_vm4, %v1941_v40, %v1407_v32 }
0x10b5   :  { %v1412_v34 = vmul.f32 %v1411_v42, %v1381_v16 }
0x10b7   :  { %v1416_v35 = vmul.f32 %v1889_v33, %v1412_v34 }
0x10b9   :  { %v1425_v36 = vpack.c.bf16 %v1416_v35, %v1416_v35 }
0x10bb   :  { %v1427_v23 = vshrl.u32 %v1425_v36, 16 }
0x10bd   :  { %v1429_v21 = vrot.slane %v1427_v23, 3 }
0x10bf   :  { %1810 = vmatmul.msk.bf16.vlgmr.msra.gmra.mxu3 %vm126_vm1, %v1429_v21 }
0x1142   :  { %v1466_v37 = vpop.f32.mrf.mxu3 }
0x1143   :  { %1471 = vst.msk [vmem:[#allocation2] sm:$0x1] %vm1470_vm5, %v1466_v37 }
0x1144   :  { %1482 = dma.vmem_to_hbm [thread:$0]  %s1478_s28, 16, %s1480_s4, [#allocation3]  }
0x114a   :  { %v1468_v39 = vpop.f32.mrf.mxu3 }
0x114b   :  { %1966 = dma.done.wait [#allocation3], 16  }
0x114c   :  { %1967 = vsyncadd [#allocation3], 4294967280 }
0x114d   :  { %1491 = vsyncpa [#allocation3], 1 }

</bundles_post_ra>
